<compile_context>
chip_gen: v7x
topology: tpu7x:2x2x1
jax: 0.10.0
libtpu: 0.0.40
codegen_flags: <defaults>
</compile_context>

<pallas_src>
import jax
import jax.numpy as jnp
from jax.experimental import pallas as pl
from jax.experimental.pallas import tpu as pltpu


_LANE = 128   # TPU lane width: output channel dim is padded to a multiple of this.
_LP = 8       # left-pad columns in the VMEM scratch so the data start is sublane-aligned.


def _round_up(x, m):
    return (x + m - 1) // m * m


def _pick_tile_h(H, W, cin, coutp, budget_bytes=8 * 1024 * 1024):
    """Largest divisor of H whose per-step working set fits the VMEM budget.

    Picking the largest TH keeps the (TH*W, Cin)@(Cin, Coutp) matmul M-dim big
    (>= ~512 rows when the image allows it) and tiles near the HBM roofline.
    The default 8 MiB budget is conservative for v5e's 16 MiB scoped default
    and v7x's 64 MiB physical VMEM; raise it (and vmem_limit_bytes) on v6e.
    """
    best = 1
    for th in range(1, H + 1):
        if H % th:
            continue
        est = (2 * th * W * cin * 4                 # double-buffered input tile
               + 2 * th * W * coutp * 4             # double-buffered output tile
               + (th + 2) * (W + _LP + 1) * cin * 4  # padded VMEM scratch
               + (th + 2) * W * cin * 4             # one shifted copy live
               + th * W * cin * 4                   # depthwise accumulator
               + th * W * coutp * 4)                # pointwise matmul result
        if est <= budget_bytes:
            best = th
    return best


# -----------------------------------------------------------------------------
# Fused kernel: depthwise 3x3 + BN + ReLU6 + pointwise 1x1 + BN + ReLU6
# -----------------------------------------------------------------------------
def _dw_pw_kernel(x_ref,      # (1, TH, W, C)     input tile (auto-pipelined)
                  xtop_ref,   # (1, 1, W, C)      row above the tile (clamped)
                  xbot_ref,   # (1, 1, W, C)      row below the tile (clamped)
                  dww_ref,    # (3, 3, C)         depthwise weights * BN scale
                  dwb_ref,    # (1, C)            depthwise BN bias
                  pww_ref,    # (C, Coutp) bf16   pointwise weights * BN scale
                  pwb_ref,    # (1, Coutp)        pointwise BN bias
                  o_ref,      # (1, TH, W, Coutp) output tile (lane-dense)
                  buf_ref):   # (TH+2, LP+W+1, C) f32 scratch (zero-padded tile)
    TH, W, C = x_ref.shape[1], x_ref.shape[2], x_ref.shape[3]
    Coutp = o_ref.shape[3]
    hb = pl.program_id(1)
    nh = pl.num_programs(1)

    # ---- Assemble the zero-padded tile in VMEM (no HBM-side jnp.pad). ----
    # Zero the (aligned) left-pad block and the right-pad column.
    buf_ref[:, 0:_LP, :] = jnp.zeros((TH + 2, _LP, C), jnp.float32)
    buf_ref[:, _LP + W:_LP + W + 1, :] = jnp.zeros((TH + 2, 1, C), jnp.float32)
    # Interior rows (the bulk tile).
    buf_ref[1:TH + 1, _LP:_LP + W, :] = x_ref[0].astype(jnp.float32)
    # Halo rows: neighbour image rows, or zeros at the image border.
    top = xtop_ref[0].astype(jnp.float32)            # (1, W, C)
    bot = xbot_ref[0].astype(jnp.float32)            # (1, W, C)
    buf_ref[0:1, _LP:_LP + W, :] = jnp.where(hb > 0, top, 0.0)
    buf_ref[TH + 1:TH + 2, _LP:_LP + W, :] = jnp.where(hb < nh - 1, bot, 0.0)

    # ---- Depthwise 3x3 (VPU). BN scale already folded into dww. ----
    # One width-W shifted read per kx (kx=1 is sublane-aligned thanks to _LP=8);
    # the ky taps are cheap outer-dim slices of that value.
    acc = jnp.zeros((TH, W, C), jnp.float32)
    for kx in range(3):
        shifted = buf_ref[:, _LP - 1 + kx:_LP - 1 + kx + W, :]   # (TH+2, W, C)
        for ky in range(3):
            acc = acc + shifted[ky:ky + TH] * dww_ref[ky, kx, :]

    dw = jnp.clip(acc + dwb_ref[0, :], 0.0, 6.0)

    # ---- Pointwise 1x1 == (TH*W, C) @ (C, Coutp) on the MXU, bf16 in / f32 acc. ----
    lhs = dw.astype(jnp.bfloat16).reshape(TH * W, C)
    pw = jnp.dot(lhs, pww_ref[...], preferred_element_type=jnp.float32)
    pw = jnp.clip(pw + pwb_ref[0, :], 0.0, 6.0)

    o_ref[...] = pw.reshape(1, TH, W, Coutp).astype(o_ref.dtype)


# -----------------------------------------------------------------------------
# Wrappers
# -----------------------------------------------------------------------------
def depthwise_conv_bn_nhwc(x_nhwc, dw_weight, pw_weight,
                           dw_scale, dw_bias, pw_scale, pw_bias, *, tile_h=None):
    """NHWC fused block. x_nhwc: (N, H, W, Cin). Returns (N, H, W, Cout) f32."""
    N, H, W, Cin = x_nhwc.shape
    Cout = pw_weight.shape[0]
    Coutp = _round_up(Cout, _LANE)   # lane-dense output channels

    # Fold BN scales into the conv weights (one-time, host side).
    dww = (jnp.transpose(dw_weight[:, 0, :, :], (1, 2, 0))
           * dw_scale[None, None, :]).astype(jnp.float32)              # (3,3,Cin)
    pww = jnp.transpose(pw_weight[:, :, 0, 0], (1, 0)) * pw_scale[None, :]
    pww = jnp.pad(pww, ((0, 0), (0, Coutp - Cout))).astype(jnp.bfloat16)  # (Cin,Coutp)
    dwb = dw_bias.reshape(1, Cin).astype(jnp.float32)
    pwb = jnp.pad(pw_bias, (0, Coutp - Cout)).reshape(1, Coutp).astype(jnp.float32)

    if tile_h is None:
        tile_h = _pick_tile_h(H, W, Cin, Coutp)
    TH = int(tile_h)
    assert H % TH == 0, (H, TH)
    nH = H // TH

    out = pl.pallas_call(
        _dw_pw_kernel,
        out_shape=jax.ShapeDtypeStruct((N, H, W, Coutp), jnp.float32),
        grid_spec=pltpu.PrefetchScalarGridSpec(
            num_scalar_prefetch=0,
            grid=(N, nH),
            in_specs=[
                # Bulk tile (non-overlapping).
                pl.BlockSpec((1, TH, W, Cin), lambda n, h: (n, h, 0, 0)),
                # Halo rows: H-block size is 1 so the index map returns a row index
                # directly; clamped at the image borders (kernel zeroes them there).
                pl.BlockSpec((1, 1, W, Cin),
                             lambda n, h: (n, jnp.maximum(h * TH - 1, 0), 0, 0)),
                pl.BlockSpec((1, 1, W, Cin),
                             lambda n, h: (n, jnp.minimum(h * TH + TH, H - 1), 0, 0)),
                # Weights / biases: index maps ignore the grid -> VMEM-resident,
                # not re-DMA'd per spatial step.
                pl.BlockSpec((3, 3, Cin), lambda n, h: (0, 0, 0)),
                pl.BlockSpec((1, Cin), lambda n, h: (0, 0)),
                pl.BlockSpec((Cin, Coutp), lambda n, h: (0, 0)),
                pl.BlockSpec((1, Coutp), lambda n, h: (0, 0)),
            ],
            out_specs=pl.BlockSpec((1, TH, W, Coutp), lambda n, h: (n, h, 0, 0)),
            scratch_shapes=[pltpu.VMEM((TH + 2, _LP + W + 1, Cin), jnp.float32)],
        ),
        compiler_params=pltpu.CompilerParams(
            dimension_semantics=("parallel", "parallel"),
            # Safe on every generation (<= 64 MiB physical on v7x, raises the
            # 16 MiB v5e default); TH is chosen from a smaller budget anyway.
            vmem_limit_bytes=32 * 1024 * 1024),
    )(x_nhwc, x_nhwc, x_nhwc, dww, dwb, pww, pwb)

    return out[..., :Cout]


def depthwise_conv_bn(x_nchw, dw_weight, pw_weight,
                      dw_scale, dw_bias, pw_scale, pw_bias, *, tile_h=None):
    """NCHW-facing wrapper matching the PyTorch module's layout convention."""
    # TODO(synk): keep NHWC end-to-end across the network to drop these two
    #             full-HBM-pass transposes (the kernel is NHWC internally).
    x_nhwc = jnp.transpose(x_nchw, (0, 2, 3, 1))
    out_nhwc = depthwise_conv_bn_nhwc(x_nhwc, dw_weight, pw_weight,
                                      dw_scale, dw_bias, pw_scale, pw_bias,
                                      tile_h=tile_h)
    return jnp.transpose(out_nhwc, (0, 3, 1, 2))


# -----------------------------------------------------------------------------
# Pure-JAX reference (XLA convs, f32) for correctness checking.
# -----------------------------------------------------------------------------
def reference(x_nchw, dw_weight, pw_weight, dw_scale, dw_bias, pw_scale, pw_bias):
    Cin = x_nchw.shape[1]
    xp = jnp.pad(x_nchw, ((0, 0), (0, 0), (1, 1), (1, 1)))
    y = jax.lax.conv_general_dilated(
        xp, dw_weight, window_strides=(1, 1), padding="VALID",
        dimension_numbers=("NCHW", "OIHW", "NCHW"),
        feature_group_count=Cin)
    y = y * dw_scale[None, :, None, None] + dw_bias[None, :, None, None]
    y = jnp.clip(y, 0.0, 6.0)
    y = jax.lax.conv_general_dilated(
        y, pw_weight, window_strides=(1, 1), padding="VALID",
        dimension_numbers=("NCHW", "OIHW", "NCHW"))
    y = y * pw_scale[None, :, None, None] + pw_bias[None, :, None, None]
    y = jnp.clip(y, 0.0, 6.0)
    return y


def _fold_bn(gamma, beta, mean, var, eps=1e-5):
    scale = gamma / jnp.sqrt(var + eps)
    bias = beta - mean * scale
    return scale, bias


if __name__ == "__main__":
    N, Cin, H, W = 2, 4, 16, 16
    Cout = 8

    key = jax.random.PRNGKey(0)
    keys = jax.random.split(key, 12)

    x = jax.random.normal(keys[0], (N, Cin, H, W), jnp.float32)

    # Conv weights (PyTorch shapes): depthwise (Cin,1,3,3), pointwise (Cout,Cin,1,1)
    dw_weight = 0.1 * jax.random.normal(keys[1], (Cin, 1, 3, 3), jnp.float32)
    pw_weight = 0.1 * jax.random.normal(keys[2], (Cout, Cin, 1, 1), jnp.float32)

    # BatchNorm parameters (inference / eval-mode), folded to scale+bias.
    dw_gamma = jax.random.uniform(keys[3], (Cin,), jnp.float32, 0.5, 1.5)
    dw_beta = 0.1 * jax.random.normal(keys[4], (Cin,), jnp.float32)
    dw_mean = 0.1 * jax.random.normal(keys[5], (Cin,), jnp.float32)
    dw_var = jax.random.uniform(keys[6], (Cin,), jnp.float32, 0.5, 1.5)

    pw_gamma = jax.random.uniform(keys[7], (Cout,), jnp.float32, 0.5, 1.5)
    pw_beta = 0.1 * jax.random.normal(keys[8], (Cout,), jnp.float32)
    pw_mean = 0.1 * jax.random.normal(keys[9], (Cout,), jnp.float32)
    pw_var = jax.random.uniform(keys[10], (Cout,), jnp.float32, 0.5, 1.5)

    dw_scale, dw_bias = _fold_bn(dw_gamma, dw_beta, dw_mean, dw_var)
    pw_scale, pw_bias = _fold_bn(pw_gamma, pw_beta, pw_mean, pw_var)

    ref = jax.block_until_ready(
        reference(x, dw_weight, pw_weight, dw_scale, dw_bias, pw_scale, pw_bias))

    # bf16 MXU path -> tolerance looser than pure-f32 (accumulation stays f32).
    tol = 5e-2

    # Explicit tile_h=8 exercises the halo / multi-tile path; default exercises
    # the automatic tile-size selection.
    for th in (8, None):
        out = depthwise_conv_bn(x, dw_weight, pw_weight,
                                dw_scale, dw_bias, pw_scale, pw_bias, tile_h=th)
        out = jax.block_until_ready(out)
        assert out.shape == (N, Cout, H, W), out.shape
        err = float(jnp.max(jnp.abs(out - ref)))
        assert jnp.allclose(out, ref, atol=tol, rtol=tol), (th, err)

    print("KERNEL_OK")
</pallas_src>

<mosaic_0001>
module attributes {stable_mosaic.version = 11 : i64} {
  func.func @_dw_pw_kernel(%arg0: i32, %arg1: i32, %arg2: memref<1x8x16x4xf32, #tpu.memory_space<vmem>>, %arg3: memref<1x1x16x4xf32, #tpu.memory_space<vmem>>, %arg4: memref<1x1x16x4xf32, #tpu.memory_space<vmem>>, %arg5: memref<3x3x4xf32, #tpu.memory_space<vmem>>, %arg6: memref<1x4xf32, #tpu.memory_space<vmem>>, %arg7: memref<4x128xbf16, #tpu.memory_space<vmem>>, %arg8: memref<1x128xf32, #tpu.memory_space<vmem>>, %arg9: memref<1x8x16x128xf32, #tpu.memory_space<vmem>>, %arg10: memref<10x25x4xf32, #tpu.memory_space<vmem>>) attributes {dimension_semantics = [#tpu.dimension_semantics<parallel>, #tpu.dimension_semantics<parallel>], iteration_bounds = array<i64: 2, 2>, scalar_prefetch = 0 : i64, scratch_operands = 1 : i64, tpu.core_type = #tpu.core_type<tc>, window_params = [{transform_indices = @transform_0, window_bounds = array<i64: 1, 8, 16, 4>}, {transform_indices = @transform_1, window_bounds = array<i64: 1, 1, 16, 4>}, {transform_indices = @transform_2, window_bounds = array<i64: 1, 1, 16, 4>}, {pipeline_mode = #tpu.pipeline_mode<synchronous>, transform_indices = @transform_3, window_bounds = array<i64: 3, 3, 4>}, {pipeline_mode = #tpu.pipeline_mode<synchronous>, transform_indices = @transform_4, window_bounds = array<i64: 1, 4>}, {pipeline_mode = #tpu.pipeline_mode<synchronous>, transform_indices = @transform_5, window_bounds = array<i64: 4, 128>}, {pipeline_mode = #tpu.pipeline_mode<synchronous>, transform_indices = @transform_6, window_bounds = array<i64: 1, 128>}, {transform_indices = @transform_7, window_bounds = array<i64: 1, 8, 16, 128>}]} {
    %cst = arith.constant 0.000000e+00 : f32
    %0 = vector.broadcast %cst : f32 to vector<10x8x4xf32>
    %c0 = arith.constant 0 : index
    %c0_0 = arith.constant 0 : index
    %c0_1 = arith.constant 0 : index
    %1 = vector.load %arg10[%c0, %c0_0, %c0_1] : memref<10x25x4xf32, #tpu.memory_space<vmem>>, vector<10x8x4xf32>
    tpu.vector_store %arg10[%c0, %c0_0, %c0_1], %0 {strides = array<i32>} : memref<10x25x4xf32, #tpu.memory_space<vmem>>, vector<10x8x4xf32>,
    %cst_2 = arith.constant 0.000000e+00 : f32
    %2 = vector.broadcast %cst_2 : f32 to vector<10x1x4xf32>
    %c0_3 = arith.constant 0 : index
    %c24 = arith.constant 24 : index
    %c0_4 = arith.constant 0 : index
    %3 = vector.load %arg10[%c0_3, %c24, %c0_4] : memref<10x25x4xf32, #tpu.memory_space<vmem>>, vector<10x1x4xf32>
    tpu.vector_store %arg10[%c0_3, %c24, %c0_4], %2 {strides = array<i32>} : memref<10x25x4xf32, #tpu.memory_space<vmem>>, vector<10x1x4xf32>,
    %c0_5 = arith.constant 0 : index
    %c0_6 = arith.constant 0 : index
    %c0_7 = arith.constant 0 : index
    %c0_8 = arith.constant 0 : index
    %4 = vector.load %arg2[%c0_5, %c0_6, %c0_7, %c0_8] : memref<1x8x16x4xf32, #tpu.memory_space<vmem>>, vector<1x8x16x4xf32>
    %5 = vector.shape_cast %4 : vector<1x8x16x4xf32> to vector<8x16x4xf32>
    %c1 = arith.constant 1 : index
    %c8 = arith.constant 8 : index
    %c0_9 = arith.constant 0 : index
    %6 = vector.load %arg10[%c1, %c8, %c0_9] : memref<10x25x4xf32, #tpu.memory_space<vmem>>, vector<8x16x4xf32>
    tpu.vector_store %arg10[%c1, %c8, %c0_9], %5 {strides = array<i32>} : memref<10x25x4xf32, #tpu.memory_space<vmem>>, vector<8x16x4xf32>,
    %c0_10 = arith.constant 0 : index
    %c0_11 = arith.constant 0 : index
    %c0_12 = arith.constant 0 : index
    %c0_13 = arith.constant 0 : index
    %7 = vector.load %arg3[%c0_10, %c0_11, %c0_12, %c0_13] : memref<1x1x16x4xf32, #tpu.memory_space<vmem>>, vector<1x1x16x4xf32>
    %8 = vector.shape_cast %7 : vector<1x1x16x4xf32> to vector<1x16x4xf32>
    %c0_14 = arith.constant 0 : index
    %c0_15 = arith.constant 0 : index
    %c0_16 = arith.constant 0 : index
    %c0_17 = arith.constant 0 : index
    %9 = vector.load %arg4[%c0_14, %c0_15, %c0_16, %c0_17] : memref<1x1x16x4xf32, #tpu.memory_space<vmem>>, vector<1x1x16x4xf32>
    %10 = vector.shape_cast %9 : vector<1x1x16x4xf32> to vector<1x16x4xf32>
    %c0_i32 = arith.constant 0 : i32
    %11 = arith.cmpi sgt, %arg1, %c0_i32 : i32
    %cst_18 = arith.constant 0.000000e+00 : f32
    %12 = vector.broadcast %cst_18 : f32 to vector<1x16x4xf32>
    %13 = arith.select %11, %8, %12 : vector<1x16x4xf32>
    %c0_19 = arith.constant 0 : index
    %c8_20 = arith.constant 8 : index
    %c0_21 = arith.constant 0 : index
    %14 = vector.load %arg10[%c0_19, %c8_20, %c0_21] : memref<10x25x4xf32, #tpu.memory_space<vmem>>, vector<1x16x4xf32>
    tpu.vector_store %arg10[%c0_19, %c8_20, %c0_21], %13 {strides = array<i32>} : memref<10x25x4xf32, #tpu.memory_space<vmem>>, vector<1x16x4xf32>,
    %c1_i32 = arith.constant 1 : i32
    %15 = arith.cmpi slt, %arg1, %c1_i32 : i32
    %cst_22 = arith.constant 0.000000e+00 : f32
    %16 = vector.broadcast %cst_22 : f32 to vector<1x16x4xf32>
    %17 = arith.select %15, %10, %16 : vector<1x16x4xf32>
    %c9 = arith.constant 9 : index
    %c8_23 = arith.constant 8 : index
    %c0_24 = arith.constant 0 : index
    %18 = vector.load %arg10[%c9, %c8_23, %c0_24] : memref<10x25x4xf32, #tpu.memory_space<vmem>>, vector<1x16x4xf32>
    tpu.vector_store %arg10[%c9, %c8_23, %c0_24], %17 {strides = array<i32>} : memref<10x25x4xf32, #tpu.memory_space<vmem>>, vector<1x16x4xf32>,
    %cst_25 = arith.constant 0.000000e+00 : f32
    %19 = vector.broadcast %cst_25 : f32 to vector<8x16x4xf32>
    %c0_26 = arith.constant 0 : index
    %c7 = arith.constant 7 : index
    %c0_27 = arith.constant 0 : index
    %20 = vector.load %arg10[%c0_26, %c7, %c0_27] : memref<10x25x4xf32, #tpu.memory_space<vmem>>, vector<10x16x4xf32>
    %21 = vector.extract_strided_slice %20 {offsets = [0, 0, 0], sizes = [8, 16, 4], strides = [1, 1, 1]} : vector<10x16x4xf32> to vector<8x16x4xf32>
    %c0_28 = arith.constant 0 : index
    %c0_29 = arith.constant 0 : index
    %c0_30 = arith.constant 0 : index
    %22 = vector.load %arg5[%c0_28, %c0_29, %c0_30] : memref<3x3x4xf32, #tpu.memory_space<vmem>>, vector<1x1x4xf32>
    %23 = vector.shape_cast %22 : vector<1x1x4xf32> to vector<4xf32>
    %24 = vector.shape_cast %23 : vector<4xf32> to vector<1x1x4xf32>
    %25 = vector.broadcast %24 : vector<1x1x4xf32> to vector<8x16x4xf32>
    %26 = arith.mulf %21, %25 : vector<8x16x4xf32>
    %27 = arith.addf %19, %26 : vector<8x16x4xf32>
    %28 = vector.extract_strided_slice %20 {offsets = [1, 0, 0], sizes = [8, 16, 4], strides = [1, 1, 1]} : vector<10x16x4xf32> to vector<8x16x4xf32>
    %c1_31 = arith.constant 1 : index
    %c0_32 = arith.constant 0 : index
    %c0_33 = arith.constant 0 : index
    %29 = vector.load %arg5[%c1_31, %c0_32, %c0_33] : memref<3x3x4xf32, #tpu.memory_space<vmem>>, vector<1x1x4xf32>
    %30 = vector.shape_cast %29 : vector<1x1x4xf32> to vector<4xf32>
    %31 = vector.shape_cast %30 : vector<4xf32> to vector<1x1x4xf32>
    %32 = vector.broadcast %31 : vector<1x1x4xf32> to vector<8x16x4xf32>
    %33 = arith.mulf %28, %32 : vector<8x16x4xf32>
    %34 = arith.addf %27, %33 : vector<8x16x4xf32>
    %35 = vector.extract_strided_slice %20 {offsets = [2, 0, 0], sizes = [8, 16, 4], strides = [1, 1, 1]} : vector<10x16x4xf32> to vector<8x16x4xf32>
    %c2 = arith.constant 2 : index
    %c0_34 = arith.constant 0 : index
    %c0_35 = arith.constant 0 : index
    %36 = vector.load %arg5[%c2, %c0_34, %c0_35] : memref<3x3x4xf32, #tpu.memory_space<vmem>>, vector<1x1x4xf32>
    %37 = vector.shape_cast %36 : vector<1x1x4xf32> to vector<4xf32>
    %38 = vector.shape_cast %37 : vector<4xf32> to vector<1x1x4xf32>
    %39 = vector.broadcast %38 : vector<1x1x4xf32> to vector<8x16x4xf32>
    %40 = arith.mulf %35, %39 : vector<8x16x4xf32>
    %41 = arith.addf %34, %40 : vector<8x16x4xf32>
    %c0_36 = arith.constant 0 : index
    %c8_37 = arith.constant 8 : index
    %c0_38 = arith.constant 0 : index
    %42 = vector.load %arg10[%c0_36, %c8_37, %c0_38] : memref<10x25x4xf32, #tpu.memory_space<vmem>>, vector<10x16x4xf32>
    %43 = vector.extract_strided_slice %42 {offsets = [0, 0, 0], sizes = [8, 16, 4], strides = [1, 1, 1]} : vector<10x16x4xf32> to vector<8x16x4xf32>
    %c0_39 = arith.constant 0 : index
    %c1_40 = arith.constant 1 : index
    %c0_41 = arith.constant 0 : index
    %44 = vector.load %arg5[%c0_39, %c1_40, %c0_41] : memref<3x3x4xf32, #tpu.memory_space<vmem>>, vector<1x1x4xf32>
    %45 = vector.shape_cast %44 : vector<1x1x4xf32> to vector<4xf32>
    %46 = vector.shape_cast %45 : vector<4xf32> to vector<1x1x4xf32>
    %47 = vector.broadcast %46 : vector<1x1x4xf32> to vector<8x16x4xf32>
    %48 = arith.mulf %43, %47 : vector<8x16x4xf32>
    %49 = arith.addf %41, %48 : vector<8x16x4xf32>
    %50 = vector.extract_strided_slice %42 {offsets = [1, 0, 0], sizes = [8, 16, 4], strides = [1, 1, 1]} : vector<10x16x4xf32> to vector<8x16x4xf32>
    %c1_42 = arith.constant 1 : index
    %c1_43 = arith.constant 1 : index
    %c0_44 = arith.constant 0 : index
    %51 = vector.load %arg5[%c1_42, %c1_43, %c0_44] : memref<3x3x4xf32, #tpu.memory_space<vmem>>, vector<1x1x4xf32>
    %52 = vector.shape_cast %51 : vector<1x1x4xf32> to vector<4xf32>
    %53 = vector.shape_cast %52 : vector<4xf32> to vector<1x1x4xf32>
    %54 = vector.broadcast %53 : vector<1x1x4xf32> to vector<8x16x4xf32>
    %55 = arith.mulf %50, %54 : vector<8x16x4xf32>
    %56 = arith.addf %49, %55 : vector<8x16x4xf32>
    %57 = vector.extract_strided_slice %42 {offsets = [2, 0, 0], sizes = [8, 16, 4], strides = [1, 1, 1]} : vector<10x16x4xf32> to vector<8x16x4xf32>
    %c2_45 = arith.constant 2 : index
    %c1_46 = arith.constant 1 : index
    %c0_47 = arith.constant 0 : index
    %58 = vector.load %arg5[%c2_45, %c1_46, %c0_47] : memref<3x3x4xf32, #tpu.memory_space<vmem>>, vector<1x1x4xf32>
    %59 = vector.shape_cast %58 : vector<1x1x4xf32> to vector<4xf32>
    %60 = vector.shape_cast %59 : vector<4xf32> to vector<1x1x4xf32>
    %61 = vector.broadcast %60 : vector<1x1x4xf32> to vector<8x16x4xf32>
    %62 = arith.mulf %57, %61 : vector<8x16x4xf32>
    %63 = arith.addf %56, %62 : vector<8x16x4xf32>
    %c0_48 = arith.constant 0 : index
    %c9_49 = arith.constant 9 : index
    %c0_50 = arith.constant 0 : index
    %64 = vector.load %arg10[%c0_48, %c9_49, %c0_50] : memref<10x25x4xf32, #tpu.memory_space<vmem>>, vector<10x16x4xf32>
    %65 = vector.extract_strided_slice %64 {offsets = [0, 0, 0], sizes = [8, 16, 4], strides = [1, 1, 1]} : vector<10x16x4xf32> to vector<8x16x4xf32>
    %c0_51 = arith.constant 0 : index
    %c2_52 = arith.constant 2 : index
    %c0_53 = arith.constant 0 : index
    %66 = vector.load %arg5[%c0_51, %c2_52, %c0_53] : memref<3x3x4xf32, #tpu.memory_space<vmem>>, vector<1x1x4xf32>
    %67 = vector.shape_cast %66 : vector<1x1x4xf32> to vector<4xf32>
    %68 = vector.shape_cast %67 : vector<4xf32> to vector<1x1x4xf32>
    %69 = vector.broadcast %68 : vector<1x1x4xf32> to vector<8x16x4xf32>
    %70 = arith.mulf %65, %69 : vector<8x16x4xf32>
    %71 = arith.addf %63, %70 : vector<8x16x4xf32>
    %72 = vector.extract_strided_slice %64 {offsets = [1, 0, 0], sizes = [8, 16, 4], strides = [1, 1, 1]} : vector<10x16x4xf32> to vector<8x16x4xf32>
    %c1_54 = arith.constant 1 : index
    %c2_55 = arith.constant 2 : index
    %c0_56 = arith.constant 0 : index
    %73 = vector.load %arg5[%c1_54, %c2_55, %c0_56] : memref<3x3x4xf32, #tpu.memory_space<vmem>>, vector<1x1x4xf32>
    %74 = vector.shape_cast %73 : vector<1x1x4xf32> to vector<4xf32>
    %75 = vector.shape_cast %74 : vector<4xf32> to vector<1x1x4xf32>
    %76 = vector.broadcast %75 : vector<1x1x4xf32> to vector<8x16x4xf32>
    %77 = arith.mulf %72, %76 : vector<8x16x4xf32>
    %78 = arith.addf %71, %77 : vector<8x16x4xf32>
    %79 = vector.extract_strided_slice %64 {offsets = [2, 0, 0], sizes = [8, 16, 4], strides = [1, 1, 1]} : vector<10x16x4xf32> to vector<8x16x4xf32>
    %c2_57 = arith.constant 2 : index
    %c2_58 = arith.constant 2 : index
    %c0_59 = arith.constant 0 : index
    %80 = vector.load %arg5[%c2_57, %c2_58, %c0_59] : memref<3x3x4xf32, #tpu.memory_space<vmem>>, vector<1x1x4xf32>
    %81 = vector.shape_cast %80 : vector<1x1x4xf32> to vector<4xf32>
    %82 = vector.shape_cast %81 : vector<4xf32> to vector<1x1x4xf32>
    %83 = vector.broadcast %82 : vector<1x1x4xf32> to vector<8x16x4xf32>
    %84 = arith.mulf %79, %83 : vector<8x16x4xf32>
    %85 = arith.addf %78, %84 : vector<8x16x4xf32>
    %c0_60 = arith.constant 0 : index
    %c0_61 = arith.constant 0 : index
    %86 = vector.load %arg6[%c0_60, %c0_61] : memref<1x4xf32, #tpu.memory_space<vmem>>, vector<1x4xf32>
    %87 = vector.shape_cast %86 : vector<1x4xf32> to vector<4xf32>
    %88 = vector.shape_cast %87 : vector<4xf32> to vector<1x1x4xf32>
    %89 = vector.broadcast %88 : vector<1x1x4xf32> to vector<8x16x4xf32>
    %90 = arith.addf %85, %89 : vector<8x16x4xf32>
    %cst_62 = arith.constant 0.000000e+00 : f32
    %cst_63 = arith.constant 6.000000e+00 : f32
    %91 = vector.broadcast %cst_62 : f32 to vector<8x16x4xf32>
    %92 = arith.maximumf %91, %90 : vector<8x16x4xf32>
    %93 = vector.broadcast %cst_63 : f32 to vector<8x16x4xf32>
    %94 = arith.minimumf %93, %92 : vector<8x16x4xf32>
    %95 = arith.truncf %94 : vector<8x16x4xf32> to vector<8x16x4xbf16>
    %96 = vector.shape_cast %95 : vector<8x16x4xbf16> to vector<128x4xbf16>
    %c0_64 = arith.constant 0 : index
    %c0_65 = arith.constant 0 : index
    %97 = vector.load %arg7[%c0_64, %c0_65] : memref<4x128xbf16, #tpu.memory_space<vmem>>, vector<4x128xbf16>
    %cst_66 = arith.constant dense<0.000000e+00> : vector<128x128xf32>
    %98 = tpu.matmul %96, %97, %cst_66 {dimension_numbers = #tpu.dot_dimension_numbers<[1], [0], [0], [1], [0, 0, 1, 1], [], []>} : vector<128x4xbf16>, vector<4x128xbf16>, vector<128x128xf32> -> vector<128x128xf32>
    %c0_67 = arith.constant 0 : index
    %c0_68 = arith.constant 0 : index
    %99 = vector.load %arg8[%c0_67, %c0_68] : memref<1x128xf32, #tpu.memory_space<vmem>>, vector<1x128xf32>
    %100 = vector.shape_cast %99 : vector<1x128xf32> to vector<128xf32>
    %101 = vector.shape_cast %100 : vector<128xf32> to vector<1x128xf32>
    %102 = vector.broadcast %101 : vector<1x128xf32> to vector<128x128xf32>
    %103 = arith.addf %98, %102 : vector<128x128xf32>
    %cst_69 = arith.constant 0.000000e+00 : f32
    %cst_70 = arith.constant 6.000000e+00 : f32
    %104 = vector.broadcast %cst_69 : f32 to vector<128x128xf32>
    %105 = arith.maximumf %104, %103 : vector<128x128xf32>
    %106 = vector.broadcast %cst_70 : f32 to vector<128x128xf32>
    %107 = arith.minimumf %106, %105 : vector<128x128xf32>
    %108 = vector.shape_cast %107 : vector<128x128xf32> to vector<1x8x16x128xf32>
    %c0_71 = arith.constant 0 : index
    %c0_72 = arith.constant 0 : index
    %c0_73 = arith.constant 0 : index
    %c0_74 = arith.constant 0 : index
    %109 = vector.load %arg9[%c0_71, %c0_72, %c0_73, %c0_74] : memref<1x8x16x128xf32, #tpu.memory_space<vmem>>, vector<1x8x16x128xf32>
    tpu.vector_store %arg9[%c0_71, %c0_72, %c0_73, %c0_74], %108 {strides = array<i32>} : memref<1x8x16x128xf32, #tpu.memory_space<vmem>>, vector<1x8x16x128xf32>,
    return
  }
  func.func @transform_0(%arg0: i32, %arg1: i32) -> (i32, i32, i32, i32) {
    %c0_i32 = arith.constant 0 : i32
    %c0_i32_0 = arith.constant 0 : i32
    %c0_i32_1 = arith.constant 0 : i32
    return %arg0, %arg1, %c0_i32, %c0_i32_0 : i32, i32, i32, i32
  }
  func.func @transform_1(%arg0: i32, %arg1: i32) -> (i32, i32, i32, i32) {
    %c8_i32 = arith.constant 8 : i32
    %0 = arith.muli %arg1, %c8_i32 : i32
    %c1_i32 = arith.constant 1 : i32
    %1 = arith.subi %0, %c1_i32 : i32
    %c0_i32 = arith.constant 0 : i32
    %2 = arith.maxsi %1, %c0_i32 : i32
    %c0_i32_0 = arith.constant 0 : i32
    %c0_i32_1 = arith.constant 0 : i32
    %c0_i32_2 = arith.constant 0 : i32
    return %arg0, %2, %c0_i32_0, %c0_i32_1 : i32, i32, i32, i32
  }
  func.func @transform_2(%arg0: i32, %arg1: i32) -> (i32, i32, i32, i32) {
    %c8_i32 = arith.constant 8 : i32
    %0 = arith.muli %arg1, %c8_i32 : i32
    %c8_i32_0 = arith.constant 8 : i32
    %1 = arith.addi %0, %c8_i32_0 : i32
    %c15_i32 = arith.constant 15 : i32
    %2 = arith.minsi %1, %c15_i32 : i32
    %c0_i32 = arith.constant 0 : i32
    %c0_i32_1 = arith.constant 0 : i32
    %c0_i32_2 = arith.constant 0 : i32
    return %arg0, %2, %c0_i32, %c0_i32_1 : i32, i32, i32, i32
  }
  func.func @transform_3(%arg0: i32, %arg1: i32) -> (i32, i32, i32) {
    %c0_i32 = arith.constant 0 : i32
    %c0_i32_0 = arith.constant 0 : i32
    %c0_i32_1 = arith.constant 0 : i32
    %c0_i32_2 = arith.constant 0 : i32
    return %c0_i32, %c0_i32_0, %c0_i32_1 : i32, i32, i32
  }
  func.func @transform_4(%arg0: i32, %arg1: i32) -> (i32, i32) {
    %c0_i32 = arith.constant 0 : i32
    %c0_i32_0 = arith.constant 0 : i32
    %c0_i32_1 = arith.constant 0 : i32
    return %c0_i32, %c0_i32_0 : i32, i32
  }
  func.func @transform_5(%arg0: i32, %arg1: i32) -> (i32, i32) {
    %c0_i32 = arith.constant 0 : i32
    %c0_i32_0 = arith.constant 0 : i32
    %c0_i32_1 = arith.constant 0 : i32
    return %c0_i32, %c0_i32_0 : i32, i32
  }
  func.func @transform_6(%arg0: i32, %arg1: i32) -> (i32, i32) {
    %c0_i32 = arith.constant 0 : i32
    %c0_i32_0 = arith.constant 0 : i32
    %c0_i32_1 = arith.constant 0 : i32
    return %c0_i32, %c0_i32_0 : i32, i32
  }
  func.func @transform_7(%arg0: i32, %arg1: i32) -> (i32, i32, i32, i32) {
    %c0_i32 = arith.constant 0 : i32
    %c0_i32_0 = arith.constant 0 : i32
    %c0_i32_1 = arith.constant 0 : i32
    return %arg0, %arg1, %c0_i32, %c0_i32_0 : i32, i32, i32, i32
  }
}

</mosaic_0001>

<bundles_post_ra>
// kernel: tpu_custom_call.1
= control target key start
LH: loop header
LB: loop body
LE: loop exit
PB: predicated region body
PF: predicated region fallthrough
CT: control target
= control target key end

     0   :  { %s2336_s0 = inlined_call_operand.vmem [shape: f32[2,16,16,4], index: 0, kind: input, shape index: {}]   ;;  %s2337_s1 = inlined_call_operand.vmem [shape: f32[2,16,16,4], index: 1, kind: input, shape index: {}]   ;;  %s2338_s2 = inlined_call_operand.vmem [shape: f32[2,16,16,4], index: 2, kind: input, shape index: {}]   ;;  %s2339_s3 = inlined_call_operand.vmem [shape: f32[3,3,4], index: 3, kind: input, shape index: {}]   ;;  %s2340_s4 = inlined_call_operand.vmem [shape: f32[1,4], index: 4, kind: input, shape index: {}]   ;;  %s2341_s5 = inlined_call_operand.vmem [shape: bf16[4,128], index: 5, kind: input, shape index: {}]   ;;  %s2342_s6 = inlined_call_operand.vmem [shape: f32[1,128], index: 6, kind: input, shape index: {}]   ;;  %s2343_s7 = inlined_call_operand.hbm [shape: f32[2,16,16,128], index: 7, kind: output, shape index: {}]  }
   0x1   :  { %2352 = sst [smem:[#allocation17_spill]] %s2341_s5 }
   0x2   :  { %12 = vsyncpa [#allocation4], 0 }
   0x3   :  { %14 = vsyncpa [#allocation4 + $0x1], 0  ;;  %s1620_s24 = smov 0   ;;  %s1622_s25 = smov 0  }
   0x4   :  { %s1624_s26 = smov 0   ;;  %s1626_s27 = smov 0  }
   0x5   :  { %s1628_s28 = smov 0   ;;  %s1630_s29 = smov 0  }
   0x6   :  { %s1632_s30 = smov 0   ;;  %s1634_s8 = smov 0  }
   0x7 LB: > { %s1295_s9 = sadd.s32 4294967295, %s1574_s8   ;;  %s1296_s10 = sadd.s32 4294967294, %s1574_s8   ;;  %s1574_s8 = sphi %s1634_s8, %s20_s8   ;;  %s1570_s30 = sphi %s1632_s30, %s2385_s30   ;;  %s1566_s29 = sphi %s1630_s29, %s2384_s29   ;;  %s1562_s28 = sphi %s1628_s28, %s2383_s28   ;;  %s1558_s27 = sphi %s1626_s27, %s2382_s27   ;;  %s1554_s26 = sphi %s1624_s26, %s2381_s26   ;;  %s1550_s25 = sphi %s1622_s25, %s2380_s25   ;;  %s1546_s24 = sphi %s1620_s24, %s2379_s24  }
   0x8   : > { %s29_s11 = sadd.s32 1, %s1566_s29  ;;  %s32_s12 = sadd.s32 1, %s1570_s30 }
   0x9   : > { %p30_p0 = scmp.ge.s32.totalorder %s29_s11, 2  ;;  %p235_p1 = scmp.ne.s32.totalorder %s1554_s26, %s1550_s25 }
   0xa   : > { %p236_p2 = scmp.eq.s32.totalorder %s1295_s9, 3  ;;  %p241_p5 = scmp.ne.s32.totalorder %s1550_s25, %s1546_s24 }
   0xb   : > { %s2387_s11 = smov (%p30_p0, %s29_s11), 0  ;;  %s2389_s12 = smov (!%p30_p0, %s32_s12), %s1570_s30 }
   0xc   : > { %s221_s13 = ssub.s32 %s1566_s29, %s2387_s11  ;;  %p1671_p3 = por %p236_p2, %p235_p1 }
   0xd   : > { %p34_p4 = scmp.ge.s32.totalorder %s2389_s12, 2  ;;  %p242_p6 = scmp.eq.s32.totalorder %s1296_s10, 3 }
   0xe   : > { %p1305_p7 = scmp.ge.s32.totalorder %s1574_s8, 1  ;;  %p326_p9 = scmp.lt.s32.totalorder %s1574_s8, 5 }
   0xf   : > { %s2391_s12 = smov (%p34_p4, %s2389_s12), 0  ;;  %p1680_p8 = por %p242_p6, %p241_p5 }
  0x10   : > { %s220_s16 = ssub.s32 %s1570_s30, %s2391_s12  ;;  %s225_s17 = sadd.s32 1, %s1554_s26 }
  0x11   : > { %s222_s18 = sor.u32 %s221_s13, %s220_s16  ;;  %p327_p10 = pnand %p1305_p7, %p326_p9 }
  0x12   : > { %p223_p11 = scmp.eq.s32.totalorder %s222_s18, 0 }
  0x13   : > { %330 = sbr.rel (%p327_p10) target bundleno = 375 (0x177), region = 48 }
  0x14   : > { %s1689_s19 = scalar_select %p223_p11, %s1554_s26, %s225_s17  }
  0x1a   : > { %s2355_s5 = sld [smem:[#allocation17_spill]]  ;;  %vm1002_vm0 = vcmask 1041408   ;;  %s1695_s22 = sshll.u32 %s1558_s27, 3  ;;  %vm436_vm1 = vcmask 31744   ;;  %vm447_vm2 = vcmask 24576   ;;  %v1576_v2 = vmov 0.0  }
  0x1b   : > { %p390_p12 = scmp.lt.s32.totalorder %s1562_s28, 1  ;;  %p392_p13 = scmp.lt.s32.totalorder %s1695_s22, 15  ;;  %441 = vst.msk [vmem:[#allocation2 + $0x80] sm:$0xff] %vm436_vm1, %v1576_v2  ;;  %442 = vst.msk [vmem:[#allocation2 + $0xa0] sm:$0xff] %vm436_vm1, %v1576_v2  ;;  %v1772_v19 = vld [vmem:[%s2339_s3] ss:$0 sm:$0xff] }
  0x1c   : > { %443 = vst.msk [vmem:[#allocation2 + $0xc0] sm:$0xff] %vm436_vm1, %v1576_v2  ;;  %444 = vst.msk [vmem:[#allocation2 + $0xe0] sm:$0xff] %vm436_vm1, %v1576_v2  ;;  %s1312_s13 = sadd.s32 4294967295, %s1695_s22  ;;  %p495_p2 = scmp.gt.s32.totalorder %s1558_s27, 0  ;;  %v1784_v20 = vld [vmem:[%s2339_s3 + $0x4] ss:$0 sm:$0xff] }
  0x1d   : > { %s391_s23 = scalar_select %p390_p12, %s1562_s28, 1  ;;  %445 = vst.msk [vmem:[#allocation2 + $0x100] sm:$0xff] %vm436_vm1, %v1576_v2  ;;  %437 = vst.msk [vmem:[#allocation2] sm:$0xff] %vm436_vm1, %v1576_v2  ;;  %v1821_v35 = vld [vmem:[%s2339_s3 + $0x8] ss:$0 sm:$0xff] }
  0x1e   : > { %452 = vst.msk [vmem:[#allocation2 + $0x98] sm:$0x1] %vm447_vm2, %v1576_v2  ;;  %453 = vst.msk [vmem:[#allocation2 + $0xb8] sm:$0x1] %vm447_vm2, %v1576_v2  ;;  %s393_s9 = scalar_select %p392_p13, %s1695_s22, 15 }
  0x1f   : > { %454 = vst.msk [vmem:[#allocation2 + $0xd8] sm:$0x1] %vm447_vm2, %v1576_v2  ;;  %448 = vst.msk [vmem:[#allocation2 + $0x18] sm:$0x1] %vm447_vm2, %v1576_v2  ;;  %s1723_s10 = sshll.u32 %s391_s23, 5  ;;  %p402_p0 = scmp.gt.s32.totalorder %s1312_s13, 0 }
  0x20   : > { %v970_v0 = vld [vmem:[%s2355_s5] sm:$0x3]  ;;  %438 = vst.msk [vmem:[#allocation2 + $0x20] sm:$0xff] %vm436_vm1, %v1576_v2  ;;  %439 = vst.msk [vmem:[#allocation2 + $0x40] sm:$0xff] %vm436_vm1, %v1576_v2  ;;  %s1308_s16 = sshll.u32 %s393_s9, 1  ;;  %p1313_p1 = scmp.lt.s32.totalorder %s1312_s13, 15 }
  0x21   : > { %1393 = vmatprep.subr.msk.bf16.mxu1 %vm1002_vm0, %v970_v0  ;;  %v1004_v1 = vsel %vm1002_vm0, %v970_v0, 0  ;;  %1392 = vmatprep.subr.msk.bf16.mxu0 %vm1002_vm0, %v970_v0  ;;  %440 = vst.msk [vmem:[#allocation2 + $0x60] sm:$0xff] %vm436_vm1, %v1576_v2  ;;  %446 = vst.msk [vmem:[#allocation2 + $0x120] sm:$0xff] %vm436_vm1, %v1576_v2  ;;  %s396_s17 = sadd.s32 %s1723_s10, %s1308_s16  ;;  %s418_s9 = sadd.s32 8, %s1695_s22  ;;  %v1859_v49 = vld [vmem:[%s2339_s3 + $0x1] ss:$0 sm:$0xff] }
  0x22   : > { %1391 = vmatpush3.bf16.msra.mxu1 %v1004_v1  ;;  %449 = vst.msk [vmem:[#allocation2 + $0x38] sm:$0x1] %vm447_vm2, %v1576_v2  ;;  %450 = vst.msk [vmem:[#allocation2 + $0x58] sm:$0x1] %vm447_vm2, %v1576_v2  ;;  %1373 = vmatpush3.bf16.msra.mxu0 %v1004_v1  ;;  %s1310_s18 = sshll.u32 %s396_s17, 3  ;;  %p1777_p4 = scmp.lt.s32.totalorder %s418_s9, 15 }
  0x23   : > { %451 = vst.msk [vmem:[#allocation2 + $0x78] sm:$0x1] %vm447_vm2, %v1576_v2  ;;  %455 = vst.msk [vmem:[#allocation2 + $0xf8] sm:$0x1] %vm447_vm2, %v1576_v2  ;;  %s1731_s5 = scalar_lea.vmem %s2336_s0, %s1310_s18  ;;  %p503_p5 = scmp.lt.s32.totalorder %s1558_s27, 1 }
  0x24   : > { %456 = vst.msk [vmem:[#allocation2 + $0x118] sm:$0x1] %vm447_vm2, %v1576_v2  ;;  %457 = vst.msk [vmem:[#allocation2 + $0x138] sm:$0x1] %vm447_vm2, %v1576_v2  ;;  %v464_v3 = vld [vmem:[%s1731_s5 + $0x30] sm:$0xff]  ;;  %v465_v4 = vld [vmem:[%s1731_s5 + $0x38] sm:$0xff] }
  0x25   : > { %v466_v5 = vld [vmem:[%s1731_s5 + $0x40] sm:$0xff]  ;;  %s403_s23 = scalar_select %p402_p0, %s1312_s13, 0  ;;  %v467_v6 = vld [vmem:[%s1731_s5 + $0x48] sm:$0xff]  ;;  %v468_v7 = vld [vmem:[%s1731_s5 + $0x50] sm:$0xff]  ;;  %481 = vst.msk [vmem:[#allocation2 + $0x88] sm:$0xff] %vm436_vm1, %v464_v3 }
  0x26   : > { %v469_v8 = vld [vmem:[%s1731_s5 + $0x58] sm:$0xff]  ;;  %482 = vst.msk [vmem:[#allocation2 + $0x90] sm:$0xff] %vm436_vm1, %v465_v4  ;;  %483 = vst.msk [vmem:[#allocation2 + $0xa8] sm:$0xff] %vm436_vm1, %v466_v5  ;;  %v470_v9 = vld [vmem:[%s1731_s5 + $0x60] sm:$0xff]  ;;  %s2395_s9 = smov (!%p1777_p4, %s418_s9), 15  ;;  %s1362_s22 = sshll.u32 %s1558_s27, 4 }
  0x27   : > { %v471_v10 = vld [vmem:[%s1731_s5 + $0x68] sm:$0xff]  ;;  %v472_v11 = vld [vmem:[%s1731_s5 + $0x70] sm:$0xff]  ;;  %484 = vst.msk [vmem:[#allocation2 + $0xb0] sm:$0xff] %vm436_vm1, %v467_v6  ;;  %485 = vst.msk [vmem:[#allocation2 + $0xc8] sm:$0xff] %vm436_vm1, %v468_v7  ;;  %s2393_s23 = smov (!%p1313_p1, %s403_s23), 15  ;;  %s2397_s9 = smov (!%p1777_p4, %s2395_s9), 15 }
  0x28   : > { %486 = vst.msk [vmem:[#allocation2 + $0xd0] sm:$0xff] %vm436_vm1, %v469_v8  ;;  %v473_v12 = vld [vmem:[%s1731_s5 + $0x78] sm:$0xff]  ;;  %487 = vst.msk [vmem:[#allocation2 + $0xe8] sm:$0xff] %vm436_vm1, %v470_v9  ;;  %v458_v13 = vld [vmem:[%s1731_s5] sm:$0xff]  ;;  %s1318_s16 = sshll.u32 %s2393_s23, 1  ;;  %s1874_s18 = sshll.u32 %s2397_s9, 1 }
  0x29   : > { %488 = vst.msk [vmem:[#allocation2 + $0xf0] sm:$0xff] %vm436_vm1, %v471_v10  ;;  %489 = vst.msk [vmem:[#allocation2 + $0x108] sm:$0xff] %vm436_vm1, %v472_v11  ;;  %v459_v14 = vld [vmem:[%s1731_s5 + $0x8] sm:$0xff]  ;;  %v460_v15 = vld [vmem:[%s1731_s5 + $0x10] sm:$0xff]  ;;  %s1763_s13 = sadd.s32 %s1318_s16, %s1723_s10  ;;  %s427_s9 = sadd.s32 %s1874_s18, %s1723_s10 }
  0x2a   : > { %490 = vst.msk [vmem:[#allocation2 + $0x110] sm:$0xff] %vm436_vm1, %v473_v12  ;;  %v461_v16 = vld [vmem:[%s1731_s5 + $0x18] sm:$0xff]  ;;  %v462_v17 = vld [vmem:[%s1731_s5 + $0x20] sm:$0xff]  ;;  %475 = vst.msk [vmem:[#allocation2 + $0x28] sm:$0xff] %vm436_vm1, %v458_v13  ;;  %s1320_s23 = sshll.u32 %s1763_s13, 3 }
  0x2b   : > { %476 = vst.msk [vmem:[#allocation2 + $0x30] sm:$0xff] %vm436_vm1, %v459_v14  ;;  %v463_v18 = vld [vmem:[%s1731_s5 + $0x28] sm:$0xff]  ;;  %477 = vst.msk [vmem:[#allocation2 + $0x48] sm:$0xff] %vm436_vm1, %v460_v15  ;;  %s1806_s16 = scalar_select %p495_p2, 255, 0 }
  0x2c   : > { %478 = vst.msk [vmem:[#allocation2 + $0x50] sm:$0xff] %vm436_vm1, %v461_v16  ;;  %479 = vst.msk [vmem:[#allocation2 + $0x68] sm:$0xff] %vm436_vm1, %v462_v17  ;;  %v1787_v21 = vld [vmem:[#allocation2 + $0x87] sm:$0xff]  ;;  %s412_s20 = scalar_lea.vmem %s2337_s1, %s1320_s23  ;;  %v1885_v1 = vld [vmem:[%s2339_s3 + $0x5] ss:$0 sm:$0xff] }
  0x2d   : > { %480 = vst.msk [vmem:[#allocation2 + $0x70] sm:$0xff] %vm436_vm1, %v463_v18  ;;  %v1789_v22 = vld [vmem:[#allocation2 + $0x8f] sm:$0xff]  ;;  %v1791_v23 = vld [vmem:[#allocation2 + $0xa7] sm:$0xff]  ;;  %v545_v27 = vmul.f32 %v1772_v19, %v1787_v21  ;;  %v1816_v34 = vmul.f32 %v1784_v20, %v1787_v21  ;;  %s1945_s17 = scalar_select %p503_p5, 255, 0 }
  0x2e   : > { %2357 = vst [vmem:[#allocation6_spill] sm:$0xff] %v1791_v23  ;;  %v1794_v24 = vld [vmem:[#allocation2 + $0xaf] sm:$0xff]  ;;  %v524_v25 = vld [vmem:[#allocation2 + $0xc7] sm:$0xff]  ;;  %v546_v28 = vmul.f32 %v1772_v19, %v1789_v22  ;;  %v1802_v29 = vmul.f32 %v1772_v19, %v1791_v23  ;;  %v1833_v39 = vmul.f32 %v1784_v20, %v1789_v22  ;;  %v583_v40 = vmul.f32 %v1784_v20, %v1791_v23 }
  0x2f   : > { %2358 = vst [vmem:[#allocation7_spill] sm:$0xff] %v1794_v24  ;;  %v525_v26 = vld [vmem:[#allocation2 + $0xcf] sm:$0xff]  ;;  %v1810_v31 = vmul.f32 %v1772_v19, %v1794_v24  ;;  %v549_v32 = vmul.f32 %v1772_v19, %v524_v25  ;;  %2359 = vst [vmem:[#allocation8_spill] sm:$0xff] %v1816_v34  ;;  %v1827_v36 = vld [vmem:[#allocation2 + $0xe7] sm:$0xff]  ;;  %v584_v41 = vmul.f32 %v1784_v20, %v1794_v24 }
  0x30   : > { %v528_v30 = vld [vmem:[#allocation2 + $0x107] sm:$0xff]  ;;  %v550_v33 = vmul.f32 %v1772_v19, %v525_v26  ;;  %v1829_v37 = vld [vmem:[#allocation2 + $0xef] sm:$0xff]  ;;  %2360 = vst [vmem:[#allocation9_spill] sm:$0xff] %v1833_v39  ;;  %v1840_v42 = vmul.f32 %v1784_v20, %v524_v25  ;;  %v1843_v43 = vmul.f32 %v1784_v20, %v525_v26  ;;  %v587_v44 = vmul.f32 %v1784_v20, %v1827_v36 }
  0x31   : > { %v529_v38 = vld [vmem:[#allocation2 + $0x10f] sm:$0xff]  ;;  %v588_v45 = vmul.f32 %v1784_v20, %v1829_v37  ;;  %v1850_v46 = vmul.f32 %v1784_v20, %v528_v30  ;;  %v599_v50 = vadd.f32 %v583_v40, %v545_v27  ;;  %v600_v51 = vadd.f32 %v584_v41, %v546_v28  ;;  %v1899_v7 = vld [vmem:[%s2339_s3 + $0x9] ss:$0 sm:$0xff]  ;;  %v1470_v13 = vld [vmem:[%s412_s20] sm:%s1806_s16] }
  0x32   : > { %v1852_v47 = vld [vmem:[#allocation2 + $0x88] sm:$0xff]  ;;  %v1854_v48 = vld [vmem:[#allocation2 + $0x90] sm:$0xff]  ;;  %v621_v52 = vmul.f32 %v1821_v35, %v524_v25  ;;  %v622_v53 = vmul.f32 %v1821_v35, %v525_v26  ;;  %v603_v55 = vadd.f32 %v587_v44, %v549_v32  ;;  %v625_v57 = vmul.f32 %v1821_v35, %v528_v30  ;;  %v1923_v27 = vld [vmem:[%s2339_s3 + $0x2] ss:$0 sm:$0xff]  ;;  %501 = vst.msk [vmem:[#allocation2 + $0x8] sm:$0xff] %vm436_vm1, %v1470_v13 }
  0x33   : > { %v1865_v54 = vld [vmem:[#allocation2 + $0xa8] sm:$0xff]  ;;  %v604_v56 = vadd.f32 %v588_v45, %v550_v33  ;;  %v626_v58 = vmul.f32 %v1821_v35, %v529_v38  ;;  %v1876_v61 = vld [vmem:[#allocation2 + $0xb0] sm:$0xff]  ;;  %v678_v63 = vmul.f32 %v1859_v49, %v1852_v47  ;;  %v679_v0 = vmul.f32 %v1859_v49, %v1854_v48 }
  0x34   : > { %2361 = vst [vmem:[#allocation10_spill] sm:$0xff] %v1865_v54  ;;  %v637_v59 = vadd.f32 %v621_v52, %v599_v50  ;;  %v638_v60 = vadd.f32 %v622_v53, %v600_v51  ;;  %2362 = vst [vmem:[#allocation11_spill] sm:$0xff] %v1876_v61  ;;  %v657_v62 = vld [vmem:[#allocation2 + $0xc8] sm:$0xff]  ;;  %v1890_v2 = vmul.f32 %v1784_v20, %v529_v38  ;;  %v658_v5 = vld [vmem:[#allocation2 + $0xd0] sm:$0xff] }
  0x35   : > { %v641_v3 = vadd.f32 %v625_v57, %v603_v55  ;;  %v642_v4 = vadd.f32 %v626_v58, %v604_v56  ;;  %v1894_v6 = vmul.f32 %v1859_v49, %v1865_v54  ;;  %v661_v8 = vld [vmem:[#allocation2 + $0x108] sm:$0xff]  ;;  %v682_v9 = vmul.f32 %v1859_v49, %v657_v62  ;;  %v1907_v16 = vld [vmem:[#allocation2 + $0xf0] sm:$0xff] }
  0x36   : > { %v683_v10 = vmul.f32 %v1859_v49, %v658_v5  ;;  %v694_v11 = vadd.f32 %v678_v63, %v637_v59  ;;  %v695_v12 = vadd.f32 %v679_v0, %v638_v60  ;;  %v1473_v14 = vld [vmem:[%s412_s20 + $0x8] sm:%s1806_s16]  ;;  %v1911_v17 = vmul.f32 %v1859_v49, %v1876_v61  ;;  %s1327_s16 = sshll.u32 %s427_s9, 3  ;;  %v662_v28 = vld [vmem:[#allocation2 + $0x110] sm:$0xff]  ;;  %v1965_v0 = vld [vmem:[%s2339_s3 + $0x6] ss:$0 sm:$0xff]  ;;  %s1356_s9 = sshll.u32 %s1562_s28, 5 }
  0x37   : > { %v1905_v15 = vld [vmem:[#allocation2 + $0xe8] sm:$0xff]  ;;  %v715_v18 = vmul.f32 %v1885_v1, %v1865_v54  ;;  %v716_v25 = vmul.f32 %v1885_v1, %v1876_v61  ;;  %v1918_v26 = vmul.f32 %v1885_v1, %v657_v62  ;;  %502 = vst.msk [vmem:[#allocation2 + $0x10] sm:$0xff] %vm436_vm1, %v1473_v14  ;;  %v698_v30 = vadd.f32 %v682_v9, %v641_v3  ;;  %v1933_v41 = vld [vmem:[#allocation2 + $0x91] sm:$0xff]  ;;  %s1954_s13 = scalar_lea.vmem %s2338_s2, %s1327_s16  ;;  %s386_s16 = sand.u32 1, %s1550_s25  }
  0x38   : > { %v699_v32 = vadd.f32 %v683_v10, %v642_v4  ;;  %v719_v33 = vmul.f32 %v1885_v1, %v1905_v15  ;;  %v720_v38 = vmul.f32 %v1885_v1, %v1907_v16  ;;  %v1931_v40 = vld [vmem:[#allocation2 + $0x89] sm:$0xff]  ;;  %2363 = vst [vmem:[#allocation12_spill] sm:$0xff] %v1933_v41  ;;  %v1936_v44 = vmul.f32 %v1885_v1, %v658_v5  ;;  %v1949_v58 = vld [vmem:[#allocation2 + $0xb1] sm:$0xff]  ;;  %s1306_s18 = sshll.u32 %s386_s16, 7  ;;  %s1165_s23 = sadd.s32 %s1362_s22, %s1356_s9 }
  0x39   : > { %v1939_v45 = vmul.f32 %v1885_v1, %v661_v8  ;;  %v731_v50 = vadd.f32 %v715_v18, %v694_v11  ;;  %v732_v51 = vadd.f32 %v716_v25, %v695_v12  ;;  %v1941_v52 = vld [vmem:[#allocation2 + $0xa9] sm:$0xff]  ;;  %v752_v56 = vmul.f32 %v1899_v7, %v657_v62  ;;  %2366 = vst [vmem:[#allocation15_spill] sm:$0xff] %v1949_v58  ;;  %v789_v9 = vld [vmem:[#allocation2 + $0xd1] sm:$0xff]  ;;  %v1476_v25 = vld [vmem:[%s1954_s13] sm:%s1945_s17]  ;;  %s1357_s27 = sshll.u32 %s1165_s23, 7 }
  0x3a   : > { %2365 = vst [vmem:[#allocation14_spill] sm:$0xff] %v1941_v52  ;;  %v735_v53 = vadd.f32 %v719_v33, %v698_v30  ;;  %v736_v55 = vadd.f32 %v720_v38, %v699_v32  ;;  %v753_v57 = vmul.f32 %v1899_v7, %v658_v5  ;;  %v756_v59 = vmul.f32 %v1899_v7, %v661_v8  ;;  %v788_v8 = vld [vmem:[#allocation2 + $0xc9] sm:$0xff]  ;;  %s2275_s21 = scalar_lea.hbm %s2343_s7, %s1357_s27 }
  0x3b   : > { %2364 = vst [vmem:[#allocation13_spill] sm:$0xff] %v1939_v45  ;;  %v757_v60 = vmul.f32 %v1899_v7, %v662_v28  ;;  %v809_v63 = vmul.f32 %v1923_v27, %v1931_v40  ;;  %v810_v62 = vmul.f32 %v1923_v27, %v1933_v41  ;;  %v1968_v3 = vmul.f32 %v1885_v1, %v662_v28  ;;  %v1984_v18 = vld [vmem:[%s2339_s3 + $0xa] ss:$0 sm:$0xff]  ;;  %v2050_v34 = vld [vmem:[#allocation2 + $0x6f] sm:$0xff] }
  0x3c   : > { %v768_v4 = vadd.f32 %v752_v56, %v731_v50  ;;  %v769_v5 = vadd.f32 %v753_v57, %v732_v51  ;;  %v1972_v10 = vmul.f32 %v1923_v27, %v1941_v52  ;;  %v772_v11 = vadd.f32 %v756_v59, %v735_v53  ;;  %510 = vst.msk [vmem:[#allocation2 + $0x128] sm:$0xff] %vm436_vm1, %v1476_v25  ;;  %v2048_v24 = vld [vmem:[#allocation2 + $0x67] sm:$0xff] }
  0x3d   : > { %2367 = vst [vmem:[#allocation16_spill] sm:$0xff] %v1968_v3  ;;  %v1974_v12 = vadd.f32 %v757_v60, %v736_v55  ;;  %v1978_v13 = vmul.f32 %v1923_v27, %v1949_v58  ;;  %v813_v14 = vmul.f32 %v1923_v27, %v788_v8  ;;  %v846_v32 = vmul.f32 %v1965_v0, %v1941_v52  ;;  %v2006_v60 = vld [vmem:[#allocation2 + $0xe9] sm:$0xff] }
  0x3e   : > { %v825_v28 = vadd.f32 %v809_v63, %v768_v4  ;;  %v826_v30 = vadd.f32 %v810_v62, %v769_v5  ;;  %v847_v33 = vmul.f32 %v1965_v0, %v1949_v58  ;;  %v1994_v38 = vmul.f32 %v1923_v27, %v789_v9  ;;  %v2008_v63 = vld [vmem:[#allocation2 + $0xf1] sm:$0xff]  ;;  %v1479_v62 = vld [vmem:[%s1954_s13 + $0x8] sm:%s1945_s17]  ;;  %v2015_v4 = vld [vmem:[%s2340_s4] ss:$0 sm:$0xff]  ;;  %s2242_s13 = scalar_lea.vmem [#allocation3], %s1306_s18  ;;  %s2284_s17 = scalar_lea.sflag [#allocation4], %s386_s16 }
  0x3f   : > { %v1996_v50 = vadd.f32 %v813_v14, %v772_v11  ;;  %v1999_v51 = vmul.f32 %v1965_v0, %v788_v8  ;;  %v2002_v53 = vmul.f32 %v1965_v0, %v789_v9  ;;  %v883_v57 = vmul.f32 %v1984_v18, %v788_v8  ;;  %v512_v14 = vld [vmem:[#allocation2 + $0x7] sm:$0xff]  ;;  %v513_v25 = vld [vmem:[#allocation2 + $0xf] sm:$0xff]  ;;  %511 = vst.msk [vmem:[#allocation2 + $0x130] sm:$0xff] %vm436_vm1, %v1479_v62  ;;  %s1168_s28 = sshll.u32 %s2242_s13, 4  ;;  %s1577_s18 = smov [#allocation3]   ;;  %s2277_s28 = int_to_ptr.vmem [resolvable:$true] %s1168_s28 }
  0x40   : > { %v862_v55 = vadd.f32 %v846_v32, %v825_v28  ;;  %v863_v56 = vadd.f32 %v847_v33, %v826_v30  ;;  %v884_v59 = vmul.f32 %v1984_v18, %v789_v9  ;;  %v601_v5 = vadd.f32 %v1840_v42, %v1802_v29  ;;  %v514_v42 = vld [vmem:[#allocation2 + $0x27] sm:$0xff]  ;;  %s1480_s20 = scalar_lea.vmem %s2277_s28, 2048  ;;  %s1484_s22 = sshll.u32 %s1577_s18, 4  ;;  %s1485_s22 = int_to_ptr.vmem [resolvable:$false] %s1484_s22 }
  0x41   : > { %v602_v11 = vadd.f32 %v1843_v43, %v1810_v31  ;;  %v623_v8 = vmul.f32 %v1821_v35, %v1827_v36  ;;  %v624_v9 = vmul.f32 %v1821_v35, %v1829_v37  ;;  %v754_v32 = vmul.f32 %v1899_v7, %v1905_v15  ;;  %v515_v31 = vld [vmem:[#allocation2 + $0x2f] sm:$0xff]  ;;  %p1481_p6 = scmp.ne.s32.totalorder %s2277_s28, %s1480_s20  ;;  %s1486_s9 = scalar_lea.vmem %s1485_s22, 4096 }
  0x42   : > { %v899_v28 = vadd.f32 %v883_v57, %v862_v55  ;;  %v900_v30 = vadd.f32 %v884_v59, %v863_v56  ;;  %v755_v29 = vmul.f32 %v1899_v7, %v1907_v16  ;;  %v885_v58 = vmul.f32 %v1984_v18, %v2006_v60  ;;  %p1487_p10 = scmp.lt.s32.totalorder %s2277_s28, %s1485_s22  ;;  %p1488_p11 = scmp.lt.s32.totalorder %s1486_s9, %s1480_s20 }
  0x43   : > { %v639_v43 = vadd.f32 %v623_v8, %v601_v5  ;;  %v640_v33 = vadd.f32 %v624_v9, %v602_v11  ;;  %v886_v52 = vmul.f32 %v1984_v18, %v2008_v63  ;;  %v537_v56 = vmul.f32 %v1772_v19, %v512_v14  ;;  %v516_v5 = vld [vmem:[#allocation2 + $0x47] sm:$0xff]  ;;  %v517_v11 = vld [vmem:[#allocation2 + $0x4f] sm:$0xff]  ;;  %p1482_p7 = pnand %p1481_p6, %p1671_p3 }
  0x44   : > { %v922_v62 = vadd.f32 %v2015_v4, %v899_v28  ;;  %v923_v55 = vadd.f32 %v2015_v4, %v900_v30  ;;  %v538_v57 = vmul.f32 %v1772_v19, %v513_v25  ;;  %v539_v8 = vmul.f32 %v1772_v19, %v514_v42  ;;  %p1489_p12 = por %p1488_p11, %p1487_p10 }
  0x45   : > { %v696_v59 = vadd.f32 %v1894_v6, %v639_v43  ;;  %v697_v61 = vadd.f32 %v1911_v17, %v640_v33  ;;  %v540_v9 = vmul.f32 %v1772_v19, %v515_v31  ;;  %v541_v28 = vmul.f32 %v1772_v19, %v516_v5  ;;  %p1483_p9 = pneg %p1482_p7 }
  0x46   : > { %v938_v54 = vmax.f32 %v922_v62, 0.0  ;;  %v939_v39 = vmax.f32 %v923_v55, 0.0  ;;  %v542_v30 = vmul.f32 %v1772_v19, %v517_v11  ;;  %v575_v6 = vmul.f32 %v1784_v20, %v514_v42 }
  0x47   : > { %v733_v14 = vadd.f32 %v1918_v26, %v696_v59  ;;  %v734_v25 = vadd.f32 %v1936_v44, %v697_v61  ;;  %v576_v17 = vmul.f32 %v1784_v20, %v515_v31  ;;  %v577_v62 = vmul.f32 %v1784_v20, %v516_v5  ;;  %p1490_p13 = pnand %p1489_p12, %p1483_p9 }
  0x48   : > { %v954_v43 = vmin.f32 %v938_v54, 6.0  ;;  %v955_v33 = vmin.f32 %v939_v39, 6.0  ;;  %v578_v55 = vmul.f32 %v1784_v20, %v517_v11  ;;  %v579_v26 = vmul.f32 %v1784_v20, %v2048_v24 }
  0x49   : > { %v770_v23 = vadd.f32 %v754_v32, %v733_v14  ;;  %v771_v41 = vadd.f32 %v755_v29, %v734_v25  ;;  %v580_v61 = vmul.f32 %v1784_v20, %v2050_v34  ;;  %v591_v42 = vadd.f32 %v575_v6, %v537_v56 }
  0x4a   : > { %v966_v44 = vpack.c.bf16 %v955_v33, %v954_v43  ;;  %v592_v54 = vadd.f32 %v576_v17, %v538_v57  ;;  %v593_v39 = vadd.f32 %v577_v62, %v539_v8  ;;  %v594_v3 = vadd.f32 %v578_v55, %v540_v9  ;;  %v647_v8 = vld [vmem:[#allocation2 + $0x28] sm:$0xff] }
  0x4b   : > { %v827_v31 = vadd.f32 %v1972_v10, %v770_v23  ;;  %v828_v59 = vadd.f32 %v1978_v13, %v771_v41  ;;  %v595_v45 = vadd.f32 %v579_v26, %v541_v28  ;;  %v596_v32 = vadd.f32 %v580_v61, %v542_v30  ;;  %v645_v10 = vld [vmem:[#allocation2 + $0x8] sm:$0xff]  ;;  %v646_v13 = vld [vmem:[#allocation2 + $0x10] sm:$0xff] }
  0x4c   : > { %1382 = vmatprep.mubr.msk.bf16.mxu1 %vm436_vm1, %v966_v44  ;;  %v613_v29 = vmul.f32 %v1821_v35, %v516_v5  ;;  %v614_v14 = vmul.f32 %v1821_v35, %v517_v11  ;;  %v615_v20 = vmul.f32 %v1821_v35, %v2048_v24  ;;  %v616_v23 = vmul.f32 %v1821_v35, %v2050_v34  ;;  %v648_v30 = vld [vmem:[#allocation2 + $0x30] sm:$0xff]  ;;  %v649_v43 = vld [vmem:[#allocation2 + $0x48] sm:$0xff] }
  0x4d   : > { %v864_v56 = vadd.f32 %v1999_v51, %v827_v31  ;;  %v865_v57 = vadd.f32 %v2002_v53, %v828_v59  ;;  %v617_v41 = vmul.f32 %v1821_v35, %v1787_v21  ;;  %v618_v5 = vmul.f32 %v1821_v35, %v1789_v22  ;;  %v650_v26 = vld [vmem:[#allocation2 + $0x50] sm:$0xff]  ;;  %v651_v61 = vld [vmem:[#allocation2 + $0x68] sm:$0xff] }
  0x4e   : > { %v629_v11 = vadd.f32 %v613_v29, %v591_v42  ;;  %v630_v9 = vadd.f32 %v614_v14, %v592_v54  ;;  %v631_v28 = vadd.f32 %v615_v20, %v593_v39  ;;  %v632_v6 = vadd.f32 %v616_v23, %v594_v3  ;;  %v652_v23 = vld [vmem:[#allocation2 + $0x70] sm:$0xff] }
  0x4f   : > { %v901_v25 = vadd.f32 %v885_v58, %v864_v56  ;;  %v902_v51 = vadd.f32 %v886_v52, %v865_v57  ;;  %v633_v53 = vadd.f32 %v617_v41, %v595_v45  ;;  %v634_v17 = vadd.f32 %v618_v5, %v596_v32 }
  0x50   : > { %v670_v33 = vmul.f32 %v1859_v49, %v645_v10  ;;  %v671_v21 = vmul.f32 %v1859_v49, %v646_v13  ;;  %v672_v62 = vmul.f32 %v1859_v49, %v647_v8  ;;  %v673_v44 = vmul.f32 %v1859_v49, %v648_v30 }
  0x51   : > { %v924_v55 = vadd.f32 %v2015_v4, %v901_v25  ;;  %v925_v22 = vadd.f32 %v2015_v4, %v902_v51  ;;  %v674_v52 = vmul.f32 %v1859_v49, %v649_v43  ;;  %v2082_v45 = vadd.f32 %v1994_v38, %v1974_v12  ;;  %v777_v51 = vld [vmem:[#allocation2 + $0x11] sm:$0xff] }
  0x52   : > { %v675_v58 = vmul.f32 %v1859_v49, %v650_v26  ;;  %v2086_v3 = vmul.f32 %v1859_v49, %v651_v61  ;;  %v686_v42 = vadd.f32 %v670_v33, %v629_v11  ;;  %v687_v31 = vadd.f32 %v671_v21, %v630_v9 }
  0x53   : > { %v940_v54 = vmax.f32 %v924_v55, 0.0  ;;  %v941_v39 = vmax.f32 %v925_v22, 0.0  ;;  %v688_v59 = vadd.f32 %v672_v62, %v631_v28  ;;  %v689_v32 = vadd.f32 %v673_v44, %v632_v6  ;;  %v779_v22 = vld [vmem:[#allocation2 + $0x31] sm:$0xff] }
  0x54   : > { %v690_v29 = vadd.f32 %v674_v52, %v633_v53  ;;  %v691_v14 = vadd.f32 %v675_v58, %v634_v17  ;;  %v707_v20 = vmul.f32 %v1885_v1, %v647_v8  ;;  %v708_v12 = vmul.f32 %v1885_v1, %v648_v30  ;;  %v776_v8 = vld [vmem:[#allocation2 + $0x9] sm:$0xff] }
  0x55   : > { %v956_v56 = vmin.f32 %v940_v54, 6.0  ;;  %v957_v57 = vmin.f32 %v941_v39, 6.0  ;;  %v709_v38 = vmul.f32 %v1885_v1, %v649_v43  ;;  %v710_v41 = vmul.f32 %v1885_v1, %v650_v26 }
  0x56   : > { %v711_v10 = vmul.f32 %v1885_v1, %v651_v61  ;;  %v712_v13 = vmul.f32 %v1885_v1, %v652_v23  ;;  %v723_v5 = vadd.f32 %v707_v20, %v686_v42  ;;  %v724_v9 = vadd.f32 %v708_v12, %v687_v31  ;;  %v780_v31 = vld [vmem:[#allocation2 + $0x49] sm:$0xff] }
  0x57   : > { %v967_v11 = vpack.c.bf16 %v957_v57, %v956_v56  ;;  %v725_v28 = vadd.f32 %v709_v38, %v688_v59  ;;  %v744_v25 = vmul.f32 %v1899_v7, %v649_v43  ;;  %v726_v6 = vadd.f32 %v710_v41, %v689_v32  ;;  %v778_v43 = vld [vmem:[#allocation2 + $0x29] sm:$0xff]  ;;  %v781_v32 = vld [vmem:[#allocation2 + $0x51] sm:$0xff] }
  0x58   : > { %v727_v53 = vadd.f32 %v711_v10, %v690_v29  ;;  %v728_v17 = vadd.f32 %v712_v13, %v691_v14  ;;  %v745_v30 = vmul.f32 %v1899_v7, %v650_v26  ;;  %v746_v33 = vmul.f32 %v1899_v7, %v651_v61  ;;  %v2115_v38 = vld [vmem:[#allocation2 + $0x69] sm:$0xff]  ;;  %v2117_v41 = vld [vmem:[#allocation2 + $0x71] sm:$0xff] }
  0x59   : > { %1383 = vmatmul.mubr.msk.bf16.vlgmr.msra.gmra.mrb[0].mxu1 %vm436_vm1, %v967_v11  ;;  %v747_v21 = vmul.f32 %v1899_v7, %v652_v23  ;;  %v748_v62 = vmul.f32 %v1899_v7, %v1852_v47  ;;  %v749_v55 = vmul.f32 %v1899_v7, %v1854_v48  ;;  %v760_v44 = vadd.f32 %v744_v25, %v723_v5 }
  0x5a   : > { %v761_v52 = vadd.f32 %v745_v30, %v724_v9  ;;  %v801_v58 = vmul.f32 %v1923_v27, %v776_v8  ;;  %v802_v26 = vmul.f32 %v1923_v27, %v777_v51  ;;  %v2106_v42 = vmul.f32 %v1859_v49, %v652_v23  ;;  %v2124_v51 = vld [vmem:[#allocation2 + $0x109] sm:$0xff] }
  0x5b   : > { %v762_v61 = vadd.f32 %v746_v33, %v725_v28  ;;  %v763_v54 = vadd.f32 %v747_v21, %v726_v6  ;;  %v764_v39 = vadd.f32 %v748_v62, %v727_v53  ;;  %v2108_v59 = vadd.f32 %v749_v55, %v728_v17  ;;  %v2126_v6 = vld [vmem:[#allocation2 + $0x111] sm:$0xff] }
  0x5c   : > { %v803_v29 = vmul.f32 %v1923_v27, %v778_v43  ;;  %v804_v14 = vmul.f32 %v1923_v27, %v779_v22  ;;  %v805_v20 = vmul.f32 %v1923_v27, %v780_v31  ;;  %v817_v56 = vadd.f32 %v801_v58, %v760_v44 }
  0x5d   : > { %v818_v57 = vadd.f32 %v802_v26, %v761_v52  ;;  %v838_v12 = vmul.f32 %v1965_v0, %v778_v43  ;;  %v839_v23 = vmul.f32 %v1965_v0, %v779_v22  ;;  %v806_v10 = vmul.f32 %v1923_v27, %v781_v32 }
  0x5e   : > { %v819_v13 = vadd.f32 %v803_v29, %v762_v61  ;;  %v820_v5 = vadd.f32 %v804_v14, %v763_v54  ;;  %v2120_v11 = vadd.f32 %v805_v20, %v764_v39  ;;  %v840_v9 = vmul.f32 %v1965_v0, %v780_v31 }
  0x5f   : > { %v841_v28 = vmul.f32 %v1965_v0, %v781_v32  ;;  %v854_v25 = vadd.f32 %v838_v12, %v817_v56  ;;  %v855_v8 = vadd.f32 %v839_v23, %v818_v57  ;;  %v875_v53 = vmul.f32 %v1984_v18, %v780_v31 }
  0x60   : > { %v876_v17 = vmul.f32 %v1984_v18, %v781_v32  ;;  %v877_v30 = vmul.f32 %v1984_v18, %v2115_v38  ;;  %v878_v33 = vmul.f32 %v1984_v18, %v2117_v41  ;;  %v856_v21 = vadd.f32 %v840_v9, %v819_v13 }
  0x61   : > { %v857_v62 = vadd.f32 %v841_v28, %v820_v5  ;;  %v850_v55 = vmul.f32 %v1965_v0, %v2006_v60  ;;  %v851_v43 = vmul.f32 %v1965_v0, %v2008_v63  ;;  %v891_v22 = vadd.f32 %v875_v53, %v854_v25  ;;  %v530_v28 = vld [vmem:[#allocation2 + $0x127] sm:$0xff]  ;;  %v531_v25 = vld [vmem:[#allocation2 + $0x12f] sm:$0xff] }
  0x62   : > { %v892_v44 = vadd.f32 %v876_v17, %v855_v8  ;;  %v887_v52 = vmul.f32 %v1984_v18, %v2124_v51  ;;  %v888_v58 = vmul.f32 %v1984_v18, %v2126_v6  ;;  %v893_v26 = vadd.f32 %v877_v30, %v856_v21 }
  0x63   : > { %v894_v61 = vadd.f32 %v878_v33, %v857_v62  ;;  %v866_v54 = vadd.f32 %v850_v55, %v1996_v50  ;;  %v867_v39 = vadd.f32 %v851_v43, %v2082_v45  ;;  %v914_v31 = vadd.f32 %v2015_v4, %v891_v22  ;;  %v663_v55 = vld [vmem:[#allocation2 + $0x128] sm:$0xff] }
  0x64   : > { %v915_v32 = vadd.f32 %v2015_v4, %v892_v44  ;;  %v551_v29 = vmul.f32 %v1772_v19, %v1827_v36  ;;  %v916_v14 = vadd.f32 %v2015_v4, %v893_v26  ;;  %v552_v50 = vmul.f32 %v1772_v19, %v1829_v37  ;;  %v664_v44 = vld [vmem:[#allocation2 + $0x130] sm:$0xff] }
  0x65   : > { %v917_v20 = vadd.f32 %v2015_v4, %v894_v61  ;;  %v903_v56 = vadd.f32 %v887_v52, %v866_v54  ;;  %v904_v57 = vadd.f32 %v888_v58, %v867_v39  ;;  %v930_v12 = vmax.f32 %v914_v31, 0.0 }
  0x66   : > { %v931_v23 = vmax.f32 %v915_v32, 0.0  ;;  %v932_v13 = vmax.f32 %v916_v14, 0.0  ;;  %v605_v53 = vadd.f32 %v1850_v46, %v551_v29  ;;  %v606_v17 = vadd.f32 %v1890_v2, %v552_v50  ;;  %v794_v32 = vld [vmem:[#allocation2 + $0x129] sm:$0xff] }
  0x67   : > { %v933_v45 = vmax.f32 %v917_v20, 0.0  ;;  %v926_v5 = vadd.f32 %v2015_v4, %v903_v56  ;;  %v927_v9 = vadd.f32 %v2015_v4, %v904_v57  ;;  %v946_v36 = vmin.f32 %v930_v12, 6.0  ;;  %v2368_v12 = vld [vmem:[#allocation13_spill] sm:$0xff]  ;;  %v2369_v50 = vld [vmem:[#allocation16_spill] sm:$0xff] }
  0x68   : > { %v947_v8 = vmin.f32 %v931_v23, 6.0  ;;  %v948_v30 = vmin.f32 %v932_v13, 6.0  ;;  %v627_v43 = vmul.f32 %v1821_v35, %v530_v28  ;;  %v628_v22 = vmul.f32 %v1821_v35, %v531_v25  ;;  %v795_v13 = vld [vmem:[#allocation2 + $0x131] sm:$0xff] }
  0x69   : > { %v949_v33 = vmin.f32 %v933_v45, 6.0  ;;  %v942_v21 = vmax.f32 %v926_v5, 0.0  ;;  %v943_v62 = vmax.f32 %v927_v9, 0.0  ;;  %v684_v52 = vmul.f32 %v1859_v49, %v1905_v15  ;;  %v2370_v45 = vld [vmem:[#allocation12_spill] sm:$0xff] }
  0x6a   : > { %v962_v37 = vpack.c.bf16 %v947_v8, %v946_v36  ;;  %v685_v46 = vmul.f32 %v1859_v49, %v1907_v16  ;;  %v822_v2 = vadd.f32 %v806_v10, %v2108_v59  ;;  %v643_v54 = vadd.f32 %v627_v43, %v605_v53  ;;  %v2371_v36 = vld [vmem:[#allocation6_spill] sm:$0xff]  ;;  %v2374_v43 = vld [vmem:[#allocation9_spill] sm:$0xff] }
  0x6b   : > { %v963_v58 = vpack.c.bf16 %v949_v33, %v948_v30  ;;  %v958_v26 = vmin.f32 %v942_v21, 6.0  ;;  %v959_v61 = vmin.f32 %v943_v62, 6.0  ;;  %v644_v39 = vadd.f32 %v628_v22, %v606_v17  ;;  %v2372_v30 = vld [vmem:[#allocation8_spill] sm:$0xff]  ;;  %v2373_v21 = vld [vmem:[#allocation7_spill] sm:$0xff] }
  0x6c   : > { %1374 = vmatprep.mubr.msk.bf16.mxu0 %vm436_vm1, %v962_v37  ;;  %v758_v31 = vmul.f32 %v1899_v7, %v663_v55  ;;  %v759_v15 = vmul.f32 %v1899_v7, %v664_v44  ;;  %v815_v14 = vmul.f32 %v1923_v27, %v2006_v60  ;;  %v816_v49 = vmul.f32 %v1923_v27, %v2008_v63 }
  0x6d   : > { %1375 = vmatmul.mubr.msk.bf16.vlgmr.msra.gmra.mrb[0].mxu0 %vm436_vm1, %v963_v58  ;;  %v968_v29 = vpack.c.bf16 %v959_v61, %v958_v26  ;;  %v700_v16 = vadd.f32 %v684_v52, %v643_v54  ;;  %v701_v59 = vadd.f32 %v685_v46, %v644_v39  ;;  %v852_v10 = vmul.f32 %v1965_v0, %v2124_v51  ;;  %v2375_v54 = vld [vmem:[#allocation10_spill] sm:$0xff] }
  0x6e   : > { %v853_v20 = vmul.f32 %v1965_v0, %v2126_v6  ;;  %v889_v56 = vmul.f32 %v1984_v18, %v794_v32  ;;  %v842_v57 = vmul.f32 %v1965_v0, %v2115_v38  ;;  %v843_v60 = vmul.f32 %v1965_v0, %v2117_v41 }
  0x6f   : > { %1386 = vmatprep.mubr.msk.bf16.mxu1 %vm436_vm1, %v968_v29  ;;  %v879_v63 = vmul.f32 %v1984_v18, %v1931_v40  ;;  %v737_v23 = vadd.f32 %v2368_v12, %v700_v16  ;;  %v738_v51 = vadd.f32 %v2369_v50, %v701_v59  ;;  %v880_v6 = vmul.f32 %v1984_v18, %v2370_v45  ;;  %v2377_v50 = vld [vmem:[#allocation14_spill] sm:$0xff] }
  0x70   : > { %v543_v5 = vmul.f32 %v1772_v19, %v2048_v24  ;;  %v858_v9 = vadd.f32 %v842_v57, %v2120_v11  ;;  %v859_v28 = vadd.f32 %v843_v60, %v822_v2  ;;  %v544_v25 = vmul.f32 %v1772_v19, %v2050_v34 }
  0x71   : > { %v619_v8 = vmul.f32 %v1821_v35, %v2371_v36  ;;  %v774_v53 = vadd.f32 %v758_v31, %v737_v23  ;;  %v775_v17 = vadd.f32 %v759_v15, %v738_v51  ;;  %v620_v62 = vmul.f32 %v1821_v35, %v2373_v21 }
  0x72   : > { %v597_v33 = vadd.f32 %v2372_v30, %v543_v5  ;;  %v890_v55 = vmul.f32 %v1984_v18, %v795_v13  ;;  %v895_v37 = vadd.f32 %v879_v63, %v858_v9  ;;  %v896_v24 = vadd.f32 %v880_v6, %v859_v28 }
  0x73   : > { %v598_v11 = vadd.f32 %v2374_v43, %v544_v25  ;;  %v831_v22 = vadd.f32 %v815_v14, %v774_v53  ;;  %v832_v44 = vadd.f32 %v816_v49, %v775_v17  ;;  %v713_v19 = vmul.f32 %v1885_v1, %v1852_v47  ;;  %v2376_v47 = vld [vmem:[#allocation11_spill] sm:$0xff] }
  0x74   : > { %v635_v52 = vadd.f32 %v619_v8, %v597_v33  ;;  %v918_v34 = vadd.f32 %v2015_v4, %v895_v37  ;;  %v919_v58 = vadd.f32 %v2015_v4, %v896_v24  ;;  %v714_v35 = vmul.f32 %v1885_v1, %v1854_v48  ;;  %v2234_v33 = vld [vmem:[%s2342_s6] ss:$0 sm:$0xff] }
  0x75   : > { %v636_v26 = vadd.f32 %v620_v62, %v598_v11  ;;  %v868_v61 = vadd.f32 %v852_v10, %v831_v22  ;;  %v869_v46 = vadd.f32 %v853_v20, %v832_v44  ;;  %v750_v39 = vmul.f32 %v1899_v7, %v2375_v54 }
  0x76   : > { %v692_v2 = vadd.f32 %v2086_v3, %v635_v52  ;;  %v934_v31 = vmax.f32 %v918_v34, 0.0  ;;  %v935_v32 = vmax.f32 %v919_v58, 0.0  ;;  %v751_v15 = vmul.f32 %v1899_v7, %v2376_v47 }
  0x77   : > { %v693_v29 = vadd.f32 %v2106_v42, %v636_v26  ;;  %v905_v14 = vadd.f32 %v889_v56, %v868_v61  ;;  %v906_v49 = vadd.f32 %v890_v55, %v869_v46  ;;  %v807_v48 = vmul.f32 %v1923_v27, %v2115_v38 }
  0x78   : > { %v729_v16 = vadd.f32 %v713_v19, %v692_v2  ;;  %v950_v1 = vmin.f32 %v934_v31, 6.0  ;;  %v951_v59 = vmin.f32 %v935_v32, 6.0  ;;  %v808_v3 = vmul.f32 %v1923_v27, %v2117_v41  ;;  %v2378_v41 = vld [vmem:[#allocation15_spill] sm:$0xff] }
  0x79   : > { %v730_v10 = vadd.f32 %v714_v35, %v693_v29  ;;  %v928_v20 = vadd.f32 %v2015_v4, %v905_v14  ;;  %v929_v57 = vadd.f32 %v2015_v4, %v906_v49  ;;  %v844_v7 = vmul.f32 %v1965_v0, %v1931_v40 }
  0x7a   : > { %v766_v42 = vadd.f32 %v750_v39, %v729_v16  ;;  %v964_v56 = vpack.c.bf16 %v951_v59, %v950_v1  ;;  %v845_v63 = vmul.f32 %v1965_v0, %v2370_v45  ;;  %v881_v51 = vmul.f32 %v1984_v18, %v2377_v50 }
  0x7b   : > { %v767_v60 = vadd.f32 %v751_v15, %v730_v10  ;;  %v944_v38 = vmax.f32 %v928_v20, 0.0  ;;  %v945_v12 = vmax.f32 %v929_v57, 0.0  ;;  %v882_v13 = vmul.f32 %v1984_v18, %v2378_v41 }
  0x7c   : > { %v823_v23 = vadd.f32 %v807_v48, %v766_v42  ;;  %1378 = vmatprep.mubr.msk.bf16.mxu0 %vm436_vm1, %v964_v56 }
  0x7d   : > { %v824_v27 = vadd.f32 %v808_v3, %v767_v60  ;;  %v960_v6 = vmin.f32 %v944_v38, 6.0  ;;  %v961_v40 = vmin.f32 %v945_v12, 6.0 }
  0x7e   : > { %v860_v5 = vadd.f32 %v844_v7, %v823_v23 }
  0x7f   : > { %v861_v9 = vadd.f32 %v845_v63, %v824_v27  ;;  %v969_v28 = vpack.c.bf16 %v961_v40, %v960_v6 }
  0x80   : > { %v897_v0 = vadd.f32 %v881_v51, %v860_v5 }
  0x81   : > { %v898_v45 = vadd.f32 %v882_v13, %v861_v9  ;;  %1387 = vmatmul.mubr.msk.bf16.gmra.mrb[4].mxu1 %vm436_vm1, %v969_v28 }
  0x82   : > { %v920_v25 = vadd.f32 %v2015_v4, %v897_v0 }
  0x83   : > { %v921_v36 = vadd.f32 %v2015_v4, %v898_v45 }
  0x84   : > { %v936_v8 = vmax.f32 %v920_v25, 0.0 }
  0x85   : > { %v937_v53 = vmax.f32 %v921_v36, 0.0 }
  0x86   : > { %v952_v17 = vmin.f32 %v936_v8, 6.0 }
  0x87   : > { %v953_v30 = vmin.f32 %v937_v53, 6.0 }
  0x89   : > { %v965_v18 = vpack.c.bf16 %v953_v30, %v952_v17 }
  0x8b   : > { %1379 = vmatmul.mubr.msk.bf16.gmra.mrb[4].mxu0 %vm436_vm1, %v965_v18 }
 0x12c   : > { %v1384_v21 = vpop.f32.mrb[0].mxu1 }
 0x12d   : > { %v1081_v62 = vadd.f32 %v1384_v21, %v2234_v33  ;;  %v1072_v55 = vpop.f32.mrb[1].mxu1 }
 0x12e   : > { %v1073_v4 = vadd.f32 %v2234_v33, %v1072_v55  ;;  %v1385_v37 = vpop.f32.mrb[2].mxu1 }
 0x12f   : > { %v1113_v24 = vmax.f32 %v1081_v62, 0.0  ;;  %v1084_v43 = vadd.f32 %v1385_v37, %v2234_v33  ;;  %v1075_v11 = vpop.f32.mrb[3].mxu1 }
 0x130   : > { %v1111_v22 = vmax.f32 %v1073_v4, 0.0  ;;  %v1076_v44 = vadd.f32 %v2234_v33, %v1075_v11 }
 0x131   : > { %v1129_v52 = vmin.f32 %v1113_v24, 6.0  ;;  %v1114_v19 = vmax.f32 %v1084_v43, 0.0 }
 0x132   : > { %v1127_v34 = vmin.f32 %v1111_v22, 6.0  ;;  %v1112_v58 = vmax.f32 %v1076_v44, 0.0 }
 0x133   : > { %1145 = vst [vmem:[%s2242_s13 + $0x50] sm:$0xff] %v1129_v52  ;;  %v1130_v26 = vmin.f32 %v1114_v19, 6.0 }
 0x134   : > { %1143 = vst [vmem:[%s2242_s13 + $0x40] sm:$0xff] %v1127_v34  ;;  %v1128_v35 = vmin.f32 %v1112_v58, 6.0 }
 0x135   : > { %1146 = vst [vmem:[%s2242_s13 + $0x58] sm:$0xff] %v1130_v26 }
 0x136   : > { %1144 = vst [vmem:[%s2242_s13 + $0x48] sm:$0xff] %v1128_v35 }
 0x140   : > { %v1376_v61 = vpop.f32.mrb[0].mxu0 }
 0x141   : > { %v1049_v46 = vadd.f32 %v1376_v61, %v2234_v33  ;;  %v1040_v2 = vpop.f32.mrb[1].mxu0 }
 0x142   : > { %v1041_v54 = vadd.f32 %v2234_v33, %v1040_v2  ;;  %v1377_v39 = vpop.f32.mrb[2].mxu0 }
 0x143   : > { %v1105_v31 = vmax.f32 %v1049_v46, 0.0  ;;  %v1052_v32 = vadd.f32 %v1377_v39, %v2234_v33  ;;  %v1043_v29 = vpop.f32.mrb[3].mxu0 }
 0x144   : > { %v1103_v47 = vmax.f32 %v1041_v54, 0.0  ;;  %v1044_v15 = vadd.f32 %v2234_v33, %v1043_v29 }
 0x145   : > { %v1121_v14 = vmin.f32 %v1105_v31, 6.0  ;;  %v1106_v49 = vmax.f32 %v1052_v32, 0.0 }
 0x146   : > { %v1119_v16 = vmin.f32 %v1103_v47, 6.0  ;;  %v1104_v48 = vmax.f32 %v1044_v15, 0.0 }
 0x147   : > { %1137 = vst [vmem:[%s2242_s13 + $0x10] sm:$0xff] %v1121_v14  ;;  %v1122_v1 = vmin.f32 %v1106_v49, 6.0 }
 0x148   : > { %1135 = vst [vmem:[%s2242_s13] sm:$0xff] %v1119_v16  ;;  %v1120_v59 = vmin.f32 %v1104_v48, 6.0 }
 0x149   : > { %1138 = vst [vmem:[%s2242_s13 + $0x18] sm:$0xff] %v1122_v1 }
 0x14a   : > { %1136 = vst [vmem:[%s2242_s13 + $0x8] sm:$0xff] %v1120_v59 }
 0x154   : > { %v1388_v10 = vpop.f32.mrb[4].mxu1 }
 0x155   : > { %v1097_v3 = vadd.f32 %v1388_v10, %v2234_v33  ;;  %v1088_v20 = vpop.f32.mrb[5].mxu1 }
 0x156   : > { %v1089_v57 = vadd.f32 %v2234_v33, %v1088_v20  ;;  %v1389_v42 = vpop.f32.mrb[6].mxu1 }
 0x157   : > { %v1117_v7 = vmax.f32 %v1097_v3, 0.0  ;;  %v1100_v56 = vadd.f32 %v1389_v42, %v2234_v33  ;;  %v1091_v60 = vpop.f32.mrb[7].mxu1 }
 0x158   : > { %v1115_v63 = vmax.f32 %v1089_v57, 0.0  ;;  %v1092_v38 = vadd.f32 %v2234_v33, %v1091_v60 }
 0x159   : > { %v1133_v12 = vmin.f32 %v1117_v7, 6.0  ;;  %v1118_v23 = vmax.f32 %v1100_v56, 0.0 }
 0x15a   : > { %v1131_v50 = vmin.f32 %v1115_v63, 6.0  ;;  %v1116_v51 = vmax.f32 %v1092_v38, 0.0 }
 0x15b   : > { %1149 = vst [vmem:[%s2242_s13 + $0x70] sm:$0xff] %v1133_v12  ;;  %v1134_v27 = vmin.f32 %v1118_v23, 6.0 }
 0x15c   : > { %1147 = vst [vmem:[%s2242_s13 + $0x60] sm:$0xff] %v1131_v50  ;;  %v1132_v41 = vmin.f32 %v1116_v51, 6.0 }
 0x15d   : > { %1150 = vst [vmem:[%s2242_s13 + $0x78] sm:$0xff] %v1134_v27 }
 0x15e   : > { %v1380_v13 = vpop.f32.mrb[4].mxu0  ;;  %1148 = vst [vmem:[%s2242_s13 + $0x68] sm:$0xff] %v1132_v41 }
 0x15f   : > { %v1065_v6 = vadd.f32 %v1380_v13, %v2234_v33  ;;  %v1056_v40 = vpop.f32.mrb[5].mxu0 }
 0x160   : > { %v1057_v5 = vadd.f32 %v2234_v33, %v1056_v40  ;;  %v1381_v9 = vpop.f32.mrb[6].mxu0 }
 0x161   : > { %v1109_v28 = vmax.f32 %v1065_v6, 0.0  ;;  %v1068_v0 = vadd.f32 %v1381_v9, %v2234_v33  ;;  %v1059_v45 = vpop.f32.mrb[7].mxu0 }
 0x162   : > { %v1107_v25 = vmax.f32 %v1057_v5, 0.0  ;;  %v1060_v36 = vadd.f32 %v2234_v33, %v1059_v45 }
 0x163   : > { %v1125_v8 = vmin.f32 %v1109_v28, 6.0  ;;  %v1110_v53 = vmax.f32 %v1068_v0, 0.0 }
 0x164   : > { %v1123_v17 = vmin.f32 %v1107_v25, 6.0  ;;  %v1108_v30 = vmax.f32 %v1060_v36, 0.0 }
 0x165   : > { %1141 = vst [vmem:[%s2242_s13 + $0x30] sm:$0xff] %v1125_v8  ;;  %v1126_v18 = vmin.f32 %v1110_v53, 6.0 }
 0x166   : > { %1139 = vst [vmem:[%s2242_s13 + $0x20] sm:$0xff] %v1123_v17  ;;  %v1124_v33 = vmin.f32 %v1108_v30, 6.0 }
 0x167   : > { %1142 = vst [vmem:[%s2242_s13 + $0x38] sm:$0xff] %v1126_v18 }
 0x168   : > { %1140 = vst [vmem:[%s2242_s13 + $0x28] sm:$0xff] %v1124_v33 }
 0x169   : > { %1493 = shalt.err (!%p1490_p13)
}
 0x16a   : > { %s1494_s16 = scalar_lea.hbm %s2275_s21, 2048  ;;  %s1498_s27 = scalar_lea.hbm %s2343_s7, 8192 }
 0x16b   : > { %p1495_p0 = scmp.ne.s32.totalorder %s2275_s21, %s1494_s16  ;;  %p1499_p4 = scmp.lt.u32.totalorder %s2275_s21, %s2343_s7 }
 0x16c   : > { %p1500_p5 = scmp.lt.u32.totalorder %s1498_s27, %s1494_s16  ;;  %p1502_p7 = scmp.lt.u32.totalorder %s1494_s16, %s2275_s21 }
 0x16d   : > { %p1496_p1 = pnand %p1495_p0, %p1671_p3 }
 0x16e   : > { %p1501_p6 = por %p1500_p5, %p1499_p4 }
 0x16f   : > { %p1497_p2 = pneg %p1496_p1 }
 0x170   : > { %p1503_p9 = por %p1502_p7, %p1501_p6 }
 0x172   : > { %p1504_p10 = pnand %p1503_p9, %p1497_p2 }
 0x174   : > { %1507 = shalt.err (!%p1504_p10)
}
 0x175   : > { %s1578_s20 = smov 128   ;;  %s1579_s18 = smov 8  }
 0x176   : > { %1394 = dma.vmem_to_hbm [thread:$0]  (%p1671_p3), %s2277_s28, 2048, %s2275_s21, %s2284_s17, %s1578_s20, %s1578_s20, %s1579_s18  }
 0x177 PF: > { %p1400_p11 = scmp.ge.s32.totalorder %s1574_s8, 2  ;;  %s1183_s22 = sand.u32 1, %s1546_s24  }
 0x178   : > { %s1184_s9 = scalar_lea.sflag [#allocation4], %s1183_s22 }
 0x179   : > { %p1397_p12 = pnand %p1400_p11, %p1680_p8 }
 0x17b   : > { %1541 = dma.done.wait (!%p1397_p12), %s1184_s9, 2048  }
 0x17c   : > { %1543 = vsyncadd (!%p1397_p12), %s1184_s9, 4294965248  ;;  %s20_s8 = sadd.s32 1, %s1574_s8   ;;  %s2379_s24 = smov %s1550_s25 }
 0x17d   : > { %p17_p13 = scmp.ge.s32.totalorder %s20_s8, 6   ;;  %s2380_s25 = smov %s1554_s26 }
 0x17e   : > { %s2381_s26 = smov %s1689_s19  ;;  %s2382_s27 = smov %s1566_s29 }
 0x17f   : > { %s2383_s28 = smov %s1570_s30  ;;  %s2384_s29 = smov %s2387_s11 }
 0x180   : > { %s2385_s30 = smov %s2391_s12  ;;  %19 = sbr.rel (!%p17_p13) target bundleno = 7 (0x7), region = 93 }
 0x187   :  { %1189 = vsyncpa [#allocation4], 1 }
 0x188   :  { %1191 = vsyncpa [#allocation4 + $0x1], 1 }

</bundles_post_ra>
